<compile_context>
chip_gen: v6e
topology: v6e:2x2x1
jax: 0.10.0
libtpu: 0.0.40
codegen_flags: <defaults>
</compile_context>

<pallas_src>
import functools

import jax
import jax.numpy as jnp
from jax import lax
from jax.experimental import pallas as pl
from jax.experimental.pallas import tpu as pltpu


def _round_up(a, m):
    return ((a + m - 1) // m) * m


def _dsconv_kernel(x_ref, w_ref, out_ref, pad_ref, patch_ref, *,
                   H, W, KH, KW, PAD, Ho, Wo, K_body):
    """One image per grid step: fused depthwise+pointwise conv via im2col.

    x_ref     : (1, Cin, H, W)        f32 NCHW activations
    w_ref     : (Cout, K_pad)         combined weight (bias column folded in)
    out_ref   : (1, Cout, Npix)       f32 lane-dense output slab
    pad_ref   : (Cin_pad, Hp, Wp)     VMEM scratch, zero-padded activations
    patch_ref : (K_pad, Npix)         VMEM scratch, im2col patch matrix
    """
    Cin = x_ref.shape[1]
    Cin_pad, Hp, Wp = pad_ref.shape
    K_pad, Npix = patch_ref.shape
    pdt = pad_ref.dtype
    cdt = patch_ref.dtype

    # ---- padded-activation scratch: zero only halo frame + extra channel
    # planes, then write the interior once.  Done every step (scratch persists
    # and lives per-core under "parallel" sharding). ----
    if Cin_pad > Cin:
        pad_ref[Cin:, :, :] = jnp.zeros((Cin_pad - Cin, Hp, Wp), pdt)
    if PAD > 0:
        pad_ref[:Cin, :PAD, :] = jnp.zeros((Cin, PAD, Wp), pdt)
        pad_ref[:Cin, PAD + H:, :] = jnp.zeros((Cin, Hp - PAD - H, Wp), pdt)
        pad_ref[:Cin, :, :PAD] = jnp.zeros((Cin, Hp, PAD), pdt)
        pad_ref[:Cin, :, PAD + W:] = jnp.zeros((Cin, Hp, Wp - PAD - W), pdt)
    pad_ref[:Cin, PAD:PAD + H, PAD:PAD + W] = x_ref[0].astype(pdt)

    # ---- im2col patch build: one aligned (Cin_pad)-row store per tap.
    # Rows tap*Cin_pad + ci match the combined-weight column layout; the
    # channel-padding rows are zero because the extra planes of pad_ref are
    # zero. ----
    for dh in range(KH):
        for dwi in range(KW):
            tap = dh * KW + dwi
            slab = pad_ref[:, dh:dh + Ho, dwi:dwi + Wo]            # (Cin_pad, Ho, Wo)
            slab = slab.reshape(Cin_pad, Ho * Wo).astype(cdt)
            patch_ref[tap * Cin_pad:(tap + 1) * Cin_pad, 0:Ho * Wo] = slab

    # ---- bias block: row K_body is all ones (bias column of w multiplies it),
    # remaining rounding rows are zero.  One aligned 8-row store. ----
    kb = K_pad - K_body
    ri = lax.broadcasted_iota(jnp.int32, (kb, Npix), 0)
    patch_ref[K_body:, :] = jnp.where(ri == 0, 1.0, 0.0).astype(cdt)

    # Lane-padding columns of the data rows (only present when Ho*Wo is not a
    # multiple of 128): keep them finite so 0-weight rows cannot NaN-poison.
    if Npix > Ho * Wo:
        patch_ref[:K_body, Ho * Wo:] = jnp.zeros((K_body, Npix - Ho * Wo), cdt)

    # ---- single MXU matmul: (Cout, K_pad) x (K_pad, Npix) -> (Cout, Npix),
    # f32 accumulation; bias already folded in. ----
    y = jnp.dot(w_ref[...], patch_ref[...], preferred_element_type=jnp.float32)
    out_ref[0] = y.astype(out_ref.dtype)


def depthwise_separable_conv_fwd(x, dw_w, dw_b, pw_w, pw_b, *, padding,
                                 use_bf16=False):
    """Forward pass matching the PyTorch depthwise_separable_conv module.

    x     : (B, Cin, H, W)     NCHW float32
    dw_w  : (Cin, 1, KH, KW)   depthwise Conv2d weight (groups=Cin)
    dw_b  : (Cin,)             depthwise bias
    pw_w  : (Cout, Cin, 1, 1)  pointwise Conv2d weight
    pw_b  : (Cout,)            pointwise bias
    Returns (B, Cout, Ho, Wo)  NCHW float32.
    """
    B, Cin, H, W = x.shape
    Cout = pw_w.shape[0]
    KH, KW = dw_w.shape[2], dw_w.shape[3]
    Ho = H + 2 * padding - KH + 1
    Wo = W + 2 * padding - KW + 1

    Cin_pad = _round_up(Cin, 8)          # sublane-aligned per-tap stride
    K_body = KH * KW * Cin_pad           # data rows of the patch matrix
    K_pad = K_body + 8                   # + ones-row for bias (+7 zero rows)
    Npix = _round_up(Ho * Wo, 128)       # lane-dense output width
    Hp, Wp = H + 2 * padding, W + 2 * padding

    compute_dtype = jnp.bfloat16 if use_bf16 else jnp.float32

    # Fold depthwise into pointwise and fold the bias into an extra column:
    #   w_comb[co, tap*Cin_pad + ci] = pw_w[co, ci] * dw_w[ci, tap]
    #   w_comb[co, K_body]           = pw_b[co] + sum_ci pw_w[co, ci]*dw_b[ci]
    dwm = dw_w.reshape(Cin, KH * KW).astype(jnp.float32)            # (ci, tap)
    pwm = pw_w.reshape(Cout, Cin).astype(jnp.float32)               # (co, ci)
    w_taps = pwm[:, None, :] * dwm.T[None, :, :]                    # (co, tap, ci)
    w_taps = jnp.pad(w_taps, ((0, 0), (0, 0), (0, Cin_pad - Cin)))  # zero pad ci
    w_body = w_taps.reshape(Cout, K_body)
    bias = pw_b.astype(jnp.float32) + pwm @ dw_b.astype(jnp.float32)
    w_bias = jnp.zeros((Cout, K_pad - K_body), jnp.float32).at[:, 0].set(bias)
    w_comb = jnp.concatenate([w_body, w_bias], axis=1).astype(compute_dtype)

    kernel = functools.partial(_dsconv_kernel, H=H, W=W, KH=KH, KW=KW,
                               PAD=padding, Ho=Ho, Wo=Wo, K_body=K_body)

    out_flat = pl.pallas_call(
        kernel,
        out_shape=jax.ShapeDtypeStruct((B, Cout, Npix), jnp.float32),
        grid_spec=pltpu.PrefetchScalarGridSpec(
            num_scalar_prefetch=0,
            grid=(B,),                               # one image per grid step
            in_specs=[
                pl.BlockSpec((1, Cin, H, W), lambda b: (b, 0, 0, 0)),
                pl.BlockSpec((Cout, K_pad), lambda b: (0, 0)),
            ],
            out_specs=pl.BlockSpec((1, Cout, Npix), lambda b: (b, 0, 0)),
            scratch_shapes=[
                pltpu.VMEM((Cin_pad, Hp, Wp), jnp.float32),   # padded acts
                pltpu.VMEM((K_pad, Npix), compute_dtype),     # im2col patch
            ],
        ),
        compiler_params=pltpu.CompilerParams(
            dimension_semantics=("parallel",)),      # both v7x TCs get work
    )(x.astype(jnp.float32), w_comb)

    # Crop lane padding (no-op here) and split Ho*Wo -> (Ho, Wo): row-major
    # metadata-only reshape, no data movement.
    return out_flat[:, :, :Ho * Wo].reshape(B, Cout, Ho, Wo)


def _reference(x, dw_w, dw_b, pw_w, pw_b, *, padding):
    """Pure-JAX reference (lax convs), f32 -- mirrors the PyTorch module."""
    Cin = x.shape[1]
    y = lax.conv_general_dilated(
        x, dw_w, (1, 1), ((padding, padding), (padding, padding)),
        feature_group_count=Cin,
        dimension_numbers=("NCHW", "OIHW", "NCHW"))
    y = y + dw_b[None, :, None, None]
    y = lax.conv_general_dilated(
        y, pw_w, (1, 1), ((0, 0), (0, 0)),
        dimension_numbers=("NCHW", "OIHW", "NCHW"))
    y = y + pw_b[None, :, None, None]
    return y


if __name__ == "__main__":
    B, nin, nout, H, W = 2, 4, 8, 16, 16
    kernel_size, padding = 3, 1

    key = jax.random.PRNGKey(0)
    kx, k1, k2, k3, k4 = jax.random.split(key, 5)
    x = jax.random.normal(kx, (B, nin, H, W), jnp.float32)          # NCHW
    dw_w = 0.3 * jax.random.normal(k1, (nin, 1, kernel_size, kernel_size),
                                   jnp.float32)
    dw_b = 0.1 * jax.random.normal(k2, (nin,), jnp.float32)
    pw_w = 0.3 * jax.random.normal(k3, (nout, nin, 1, 1), jnp.float32)
    pw_b = 0.1 * jax.random.normal(k4, (nout,), jnp.float32)

    ref = jax.block_until_ready(
        _reference(x, dw_w, dw_b, pw_w, pw_b, padding=padding))

    # f32 operands (default): exact semantics of the PyTorch f32 module.
    out = jax.block_until_ready(
        depthwise_separable_conv_fwd(x, dw_w, dw_b, pw_w, pw_b,
                                     padding=padding, use_bf16=False))
    assert out.shape == (B, nout, H, W)
    assert jnp.allclose(out, ref, atol=1e-4, rtol=1e-4), "mismatch vs reference"

    print("KERNEL_OK")
</pallas_src>

<mosaic_0001>
module attributes {stable_mosaic.version = 11 : i64} {
  func.func @_dsconv_kernel(%arg0: i32, %arg1: memref<1x4x16x16xf32, #tpu.memory_space<vmem>>, %arg2: memref<8x80xf32, #tpu.memory_space<vmem>>, %arg3: memref<1x8x256xf32, #tpu.memory_space<vmem>>, %arg4: memref<8x18x18xf32, #tpu.memory_space<vmem>>, %arg5: memref<80x256xf32, #tpu.memory_space<vmem>>) attributes {dimension_semantics = [#tpu.dimension_semantics<parallel>], iteration_bounds = array<i64: 2>, scalar_prefetch = 0 : i64, scratch_operands = 2 : i64, tpu.core_type = #tpu.core_type<tc>, window_params = [{transform_indices = @transform_0, window_bounds = array<i64: 1, 4, 16, 16>}, {pipeline_mode = #tpu.pipeline_mode<synchronous>, transform_indices = @transform_1, window_bounds = array<i64: 8, 80>}, {transform_indices = @transform_2, window_bounds = array<i64: 1, 8, 256>}]} {
    %cst = arith.constant 0.000000e+00 : f32
    %0 = vector.broadcast %cst : f32 to vector<4x18x18xf32>
    %c4 = arith.constant 4 : index
    %c0 = arith.constant 0 : index
    %c0_0 = arith.constant 0 : index
    %1 = vector.load %arg4[%c4, %c0, %c0_0] : memref<8x18x18xf32, #tpu.memory_space<vmem>>, vector<4x18x18xf32>
    tpu.vector_store %arg4[%c4, %c0, %c0_0], %0 {strides = array<i32>} : memref<8x18x18xf32, #tpu.memory_space<vmem>>, vector<4x18x18xf32>,
    %cst_1 = arith.constant 0.000000e+00 : f32
    %2 = vector.broadcast %cst_1 : f32 to vector<4x1x18xf32>
    %c0_2 = arith.constant 0 : index
    %c0_3 = arith.constant 0 : index
    %c0_4 = arith.constant 0 : index
    %3 = vector.load %arg4[%c0_2, %c0_3, %c0_4] : memref<8x18x18xf32, #tpu.memory_space<vmem>>, vector<4x1x18xf32>
    tpu.vector_store %arg4[%c0_2, %c0_3, %c0_4], %2 {strides = array<i32>} : memref<8x18x18xf32, #tpu.memory_space<vmem>>, vector<4x1x18xf32>,
    %cst_5 = arith.constant 0.000000e+00 : f32
    %4 = vector.broadcast %cst_5 : f32 to vector<4x1x18xf32>
    %c0_6 = arith.constant 0 : index
    %c17 = arith.constant 17 : index
    %c0_7 = arith.constant 0 : index
    %5 = vector.load %arg4[%c0_6, %c17, %c0_7] : memref<8x18x18xf32, #tpu.memory_space<vmem>>, vector<4x1x18xf32>
    tpu.vector_store %arg4[%c0_6, %c17, %c0_7], %4 {strides = array<i32>} : memref<8x18x18xf32, #tpu.memory_space<vmem>>, vector<4x1x18xf32>,
    %cst_8 = arith.constant 0.000000e+00 : f32
    %6 = vector.broadcast %cst_8 : f32 to vector<4x18x1xf32>
    %c0_9 = arith.constant 0 : index
    %c0_10 = arith.constant 0 : index
    %c0_11 = arith.constant 0 : index
    %7 = vector.load %arg4[%c0_9, %c0_10, %c0_11] : memref<8x18x18xf32, #tpu.memory_space<vmem>>, vector<4x18x1xf32>
    tpu.vector_store %arg4[%c0_9, %c0_10, %c0_11], %6 {strides = array<i32>} : memref<8x18x18xf32, #tpu.memory_space<vmem>>, vector<4x18x1xf32>,
    %cst_12 = arith.constant 0.000000e+00 : f32
    %8 = vector.broadcast %cst_12 : f32 to vector<4x18x1xf32>
    %c0_13 = arith.constant 0 : index
    %c0_14 = arith.constant 0 : index
    %c17_15 = arith.constant 17 : index
    %9 = vector.load %arg4[%c0_13, %c0_14, %c17_15] : memref<8x18x18xf32, #tpu.memory_space<vmem>>, vector<4x18x1xf32>
    tpu.vector_store %arg4[%c0_13, %c0_14, %c17_15], %8 {strides = array<i32>} : memref<8x18x18xf32, #tpu.memory_space<vmem>>, vector<4x18x1xf32>,
    %c0_16 = arith.constant 0 : index
    %c0_17 = arith.constant 0 : index
    %c0_18 = arith.constant 0 : index
    %c0_19 = arith.constant 0 : index
    %10 = vector.load %arg1[%c0_16, %c0_17, %c0_18, %c0_19] : memref<1x4x16x16xf32, #tpu.memory_space<vmem>>, vector<1x4x16x16xf32>
    %11 = vector.shape_cast %10 : vector<1x4x16x16xf32> to vector<4x16x16xf32>
    %c0_20 = arith.constant 0 : index
    %c1 = arith.constant 1 : index
    %c1_21 = arith.constant 1 : index
    %12 = vector.load %arg4[%c0_20, %c1, %c1_21] : memref<8x18x18xf32, #tpu.memory_space<vmem>>, vector<4x16x16xf32>
    tpu.vector_store %arg4[%c0_20, %c1, %c1_21], %11 {strides = array<i32>} : memref<8x18x18xf32, #tpu.memory_space<vmem>>, vector<4x16x16xf32>,
    %c0_22 = arith.constant 0 : index
    %c0_23 = arith.constant 0 : index
    %c0_24 = arith.constant 0 : index
    %13 = vector.load %arg4[%c0_22, %c0_23, %c0_24] : memref<8x18x18xf32, #tpu.memory_space<vmem>>, vector<8x16x16xf32>
    %14 = vector.shape_cast %13 : vector<8x16x16xf32> to vector<8x256xf32>
    %c0_25 = arith.constant 0 : index
    %c0_26 = arith.constant 0 : index
    %15 = vector.load %arg5[%c0_25, %c0_26] : memref<80x256xf32, #tpu.memory_space<vmem>>, vector<8x256xf32>
    tpu.vector_store %arg5[%c0_25, %c0_26], %14 {strides = array<i32>} : memref<80x256xf32, #tpu.memory_space<vmem>>, vector<8x256xf32>,
    %c0_27 = arith.constant 0 : index
    %c0_28 = arith.constant 0 : index
    %c1_29 = arith.constant 1 : index
    %16 = vector.load %arg4[%c0_27, %c0_28, %c1_29] : memref<8x18x18xf32, #tpu.memory_space<vmem>>, vector<8x16x16xf32>
    %17 = vector.shape_cast %16 : vector<8x16x16xf32> to vector<8x256xf32>
    %c8 = arith.constant 8 : index
    %c0_30 = arith.constant 0 : index
    %18 = vector.load %arg5[%c8, %c0_30] : memref<80x256xf32, #tpu.memory_space<vmem>>, vector<8x256xf32>
    tpu.vector_store %arg5[%c8, %c0_30], %17 {strides = array<i32>} : memref<80x256xf32, #tpu.memory_space<vmem>>, vector<8x256xf32>,
    %c0_31 = arith.constant 0 : index
    %c0_32 = arith.constant 0 : index
    %c2 = arith.constant 2 : index
    %19 = vector.load %arg4[%c0_31, %c0_32, %c2] : memref<8x18x18xf32, #tpu.memory_space<vmem>>, vector<8x16x16xf32>
    %20 = vector.shape_cast %19 : vector<8x16x16xf32> to vector<8x256xf32>
    %c16 = arith.constant 16 : index
    %c0_33 = arith.constant 0 : index
    %21 = vector.load %arg5[%c16, %c0_33] : memref<80x256xf32, #tpu.memory_space<vmem>>, vector<8x256xf32>
    tpu.vector_store %arg5[%c16, %c0_33], %20 {strides = array<i32>} : memref<80x256xf32, #tpu.memory_space<vmem>>, vector<8x256xf32>,
    %c0_34 = arith.constant 0 : index
    %c1_35 = arith.constant 1 : index
    %c0_36 = arith.constant 0 : index
    %22 = vector.load %arg4[%c0_34, %c1_35, %c0_36] : memref<8x18x18xf32, #tpu.memory_space<vmem>>, vector<8x16x16xf32>
    %23 = vector.shape_cast %22 : vector<8x16x16xf32> to vector<8x256xf32>
    %c24 = arith.constant 24 : index
    %c0_37 = arith.constant 0 : index
    %24 = vector.load %arg5[%c24, %c0_37] : memref<80x256xf32, #tpu.memory_space<vmem>>, vector<8x256xf32>
    tpu.vector_store %arg5[%c24, %c0_37], %23 {strides = array<i32>} : memref<80x256xf32, #tpu.memory_space<vmem>>, vector<8x256xf32>,
    %c0_38 = arith.constant 0 : index
    %c1_39 = arith.constant 1 : index
    %c1_40 = arith.constant 1 : index
    %25 = vector.load %arg4[%c0_38, %c1_39, %c1_40] : memref<8x18x18xf32, #tpu.memory_space<vmem>>, vector<8x16x16xf32>
    %26 = vector.shape_cast %25 : vector<8x16x16xf32> to vector<8x256xf32>
    %c32 = arith.constant 32 : index
    %c0_41 = arith.constant 0 : index
    %27 = vector.load %arg5[%c32, %c0_41] : memref<80x256xf32, #tpu.memory_space<vmem>>, vector<8x256xf32>
    tpu.vector_store %arg5[%c32, %c0_41], %26 {strides = array<i32>} : memref<80x256xf32, #tpu.memory_space<vmem>>, vector<8x256xf32>,
    %c0_42 = arith.constant 0 : index
    %c1_43 = arith.constant 1 : index
    %c2_44 = arith.constant 2 : index
    %28 = vector.load %arg4[%c0_42, %c1_43, %c2_44] : memref<8x18x18xf32, #tpu.memory_space<vmem>>, vector<8x16x16xf32>
    %29 = vector.shape_cast %28 : vector<8x16x16xf32> to vector<8x256xf32>
    %c40 = arith.constant 40 : index
    %c0_45 = arith.constant 0 : index
    %30 = vector.load %arg5[%c40, %c0_45] : memref<80x256xf32, #tpu.memory_space<vmem>>, vector<8x256xf32>
    tpu.vector_store %arg5[%c40, %c0_45], %29 {strides = array<i32>} : memref<80x256xf32, #tpu.memory_space<vmem>>, vector<8x256xf32>,
    %c0_46 = arith.constant 0 : index
    %c2_47 = arith.constant 2 : index
    %c0_48 = arith.constant 0 : index
    %31 = vector.load %arg4[%c0_46, %c2_47, %c0_48] : memref<8x18x18xf32, #tpu.memory_space<vmem>>, vector<8x16x16xf32>
    %32 = vector.shape_cast %31 : vector<8x16x16xf32> to vector<8x256xf32>
    %c48 = arith.constant 48 : index
    %c0_49 = arith.constant 0 : index
    %33 = vector.load %arg5[%c48, %c0_49] : memref<80x256xf32, #tpu.memory_space<vmem>>, vector<8x256xf32>
    tpu.vector_store %arg5[%c48, %c0_49], %32 {strides = array<i32>} : memref<80x256xf32, #tpu.memory_space<vmem>>, vector<8x256xf32>,
    %c0_50 = arith.constant 0 : index
    %c2_51 = arith.constant 2 : index
    %c1_52 = arith.constant 1 : index
    %34 = vector.load %arg4[%c0_50, %c2_51, %c1_52] : memref<8x18x18xf32, #tpu.memory_space<vmem>>, vector<8x16x16xf32>
    %35 = vector.shape_cast %34 : vector<8x16x16xf32> to vector<8x256xf32>
    %c56 = arith.constant 56 : index
    %c0_53 = arith.constant 0 : index
    %36 = vector.load %arg5[%c56, %c0_53] : memref<80x256xf32, #tpu.memory_space<vmem>>, vector<8x256xf32>
    tpu.vector_store %arg5[%c56, %c0_53], %35 {strides = array<i32>} : memref<80x256xf32, #tpu.memory_space<vmem>>, vector<8x256xf32>,
    %c0_54 = arith.constant 0 : index
    %c2_55 = arith.constant 2 : index
    %c2_56 = arith.constant 2 : index
    %37 = vector.load %arg4[%c0_54, %c2_55, %c2_56] : memref<8x18x18xf32, #tpu.memory_space<vmem>>, vector<8x16x16xf32>
    %38 = vector.shape_cast %37 : vector<8x16x16xf32> to vector<8x256xf32>
    %c64 = arith.constant 64 : index
    %c0_57 = arith.constant 0 : index
    %39 = vector.load %arg5[%c64, %c0_57] : memref<80x256xf32, #tpu.memory_space<vmem>>, vector<8x256xf32>
    tpu.vector_store %arg5[%c64, %c0_57], %38 {strides = array<i32>} : memref<80x256xf32, #tpu.memory_space<vmem>>, vector<8x256xf32>,
    %40 = tpu.iota {dimensions = array<i32: 0>} : vector<8x256xi32>
    %c0_i32 = arith.constant 0 : i32
    %41 = vector.broadcast %c0_i32 : i32 to vector<8x256xi32>
    %42 = arith.cmpi eq, %40, %41 : vector<8x256xi32>
    %cst_58 = arith.constant 1.000000e+00 : f32
    %cst_59 = arith.constant 0.000000e+00 : f32
    %43 = vector.broadcast %cst_58 : f32 to vector<8x256xf32>
    %44 = vector.broadcast %cst_59 : f32 to vector<8x256xf32>
    %45 = arith.select %42, %43, %44 : vector<8x256xi1>, vector<8x256xf32>
    %c72 = arith.constant 72 : index
    %c0_60 = arith.constant 0 : index
    %46 = vector.load %arg5[%c72, %c0_60] : memref<80x256xf32, #tpu.memory_space<vmem>>, vector<8x256xf32>
    tpu.vector_store %arg5[%c72, %c0_60], %45 {strides = array<i32>} : memref<80x256xf32, #tpu.memory_space<vmem>>, vector<8x256xf32>,
    %c0_61 = arith.constant 0 : index
    %c0_62 = arith.constant 0 : index
    %47 = vector.load %arg2[%c0_61, %c0_62] : memref<8x80xf32, #tpu.memory_space<vmem>>, vector<8x80xf32>
    %c0_63 = arith.constant 0 : index
    %c0_64 = arith.constant 0 : index
    %48 = vector.load %arg5[%c0_63, %c0_64] : memref<80x256xf32, #tpu.memory_space<vmem>>, vector<80x256xf32>
    %cst_65 = arith.constant dense<0.000000e+00> : vector<8x256xf32>
    %49 = tpu.matmul %47, %48, %cst_65 {dimension_numbers = #tpu.dot_dimension_numbers<[1], [0], [0], [1], [0, 0, 1, 1], [], []>} : vector<8x80xf32>, vector<80x256xf32>, vector<8x256xf32> -> vector<8x256xf32>
    %c0_66 = arith.constant 0 : index
    %c0_67 = arith.constant 0 : index
    %c0_68 = arith.constant 0 : index
    %50 = vector.load %arg3[%c0_66, %c0_67, %c0_68] : memref<1x8x256xf32, #tpu.memory_space<vmem>>, vector<1x8x256xf32>
    %51 = vector.shape_cast %50 : vector<1x8x256xf32> to vector<8x256xf32>
    %52 = vector.shape_cast %49 : vector<8x256xf32> to vector<1x8x256xf32>
    tpu.vector_store %arg3[%c0_66, %c0_67, %c0_68], %52 {strides = array<i32>} : memref<1x8x256xf32, #tpu.memory_space<vmem>>, vector<1x8x256xf32>,
    return
  }
  func.func @transform_0(%arg0: i32) -> (i32, i32, i32, i32) {
    %c0_i32 = arith.constant 0 : i32
    %c0_i32_0 = arith.constant 0 : i32
    %c0_i32_1 = arith.constant 0 : i32
    %c0_i32_2 = arith.constant 0 : i32
    return %arg0, %c0_i32, %c0_i32_0, %c0_i32_1 : i32, i32, i32, i32
  }
  func.func @transform_1(%arg0: i32) -> (i32, i32) {
    %c0_i32 = arith.constant 0 : i32
    %c0_i32_0 = arith.constant 0 : i32
    %c0_i32_1 = arith.constant 0 : i32
    return %c0_i32, %c0_i32_0 : i32, i32
  }
  func.func @transform_2(%arg0: i32) -> (i32, i32, i32) {
    %c0_i32 = arith.constant 0 : i32
    %c0_i32_0 = arith.constant 0 : i32
    %c0_i32_1 = arith.constant 0 : i32
    return %arg0, %c0_i32, %c0_i32_0 : i32, i32, i32
  }
}

</mosaic_0001>

<bundles_post_ra>
// kernel: tpu_custom_call.1
= control target key start
LH: loop header
LB: loop body
LE: loop exit
PB: predicated region body
PF: predicated region fallthrough
CT: control target
= control target key end

     0   :  { %7 = vsyncpa [#allocation5], 0  ;;  %s6966_s0 = inlined_call_operand.hbm [shape: f32[2,4,16,16], index: 0, kind: input, shape index: {}]   ;;  %s6967_s1 = inlined_call_operand.hbm [shape: f32[8,80], index: 1, kind: input, shape index: {}]   ;;  %s6968_s2 = inlined_call_operand.hbm [shape: f32[2,8,256], index: 2, kind: output, shape index: {}]  }
   0x1   :  { %9 = vsyncpa [#allocation5 + $0x1], 0 }
   0x2   :  { %10 = vsyncpa [#allocation8], 0 }
   0x3   :  { %11 = vsyncpa [#allocation6], 0 }
   0x4   :  { %13 = vsyncpa [#allocation6 + $0x1], 0  ;;  %s4411_s9 = smov 0   ;;  %s4413_s10 = smov 0  }
   0x5   :  { %s4415_s11 = smov 0   ;;  %s4417_s12 = smov 0  }
   0x6 LB: > { %s4432_s13 = sadd.s32 4294967295, %s4375_s12   ;;  %s4105_s14 = sadd.s32 4294967294, %s4375_s12   ;;  %s4375_s12 = sphi %s4417_s12, %s7365_s12   ;;  %s4371_s11 = sphi %s4415_s11, %s7364_s11   ;;  %s4367_s10 = sphi %s4413_s10, %s7363_s10   ;;  %s4363_s9 = sphi %s4411_s9, %s7362_s9  }
   0x7   : > { %s4436_s15 = sadd.s32 1, %s4375_s12   ;;  %s26_s16 = sadd.s32 1, %s4371_s11 }
   0x8   : > { %s23_s17 = ssub.s32 %s4375_s12, %s4436_s15  ;;  %p33_p0 = scmp.ne.s32.totalorder %s4371_s11, %s4367_s10 }
   0x9   : > { %p24_p1 = scmp.eq.s32.totalorder %s23_s17, 0  ;;  %p34_p2 = scmp.eq.s32.totalorder %s4375_s12, 0 }
   0xa   : > { %p39_p3 = scmp.ne.s32.totalorder %s4367_s10, %s4363_s9  ;;  %p6969_p4 = scmp.eq.s32.totalorder %s4432_s13, 0 }
   0xb   : > { %s4448_s18 = scalar_select %p24_p1, %s4371_s11, %s26_s16  }
   0xc   : > { %p4450_p5 = por %p34_p2, %p33_p0  ;;  %p4456_p6 = por %p6969_p4, %p39_p3 }
   0xd   : > { %p84_p7 = scmp.eq.s32.totalorder %s4432_s13, 1  ;;  %p90_p8 = scmp.eq.s32.totalorder %s4105_s14, 1 }
   0xe   : > { %s7073_s20 = scalar_select %p4456_p6, 1, 0 }
   0xf   : > { %p4106_p9 = scmp.ge.s32.totalorder %s4375_s12, 1  ;;  %p97_p10 = scmp.lt.s32.totalorder %s4375_s12, 3 }
  0x10   : > { %p4463_p11 = por %p84_p7, %p33_p0  ;;  %p4467_p12 = por %p90_p8, %p39_p3 }
  0x11   : > { %p4471_p13 = pnand %p4106_p9, %p97_p10  ;;  %s4377_s24 = smov [#allocation7]  }
  0x12   : > { %s7074_s21 = scalar_select %p4463_p11, 1, 0 }
  0x13   : > { %s7075_s22 = scalar_select %p4467_p12, 1, 0 }
  0x14   : > { %s7076_s23 = scalar_select %p4471_p13, 1, 0 }
  0x15   : > { %p4134_p2 = pneg %p4471_p13  ;;  %s110_s25 = sshll.u32 %s4377_s24, 4  ;;  %s111_s25 = int_to_ptr.vmem [resolvable:$true] %s110_s25 }
  0x16   : > { %p4147_p4 = scmp.lt.s32.totalorder %s4375_s12, 2  ;;  %p7077_p0 = scmp.eq.s32.totalorder %s4432_s13, 0 }
  0x17   : > { %s121_s27 = sand.u32 1, %s4371_s11   ;;  %s4264_s30 = scalar_lea.vmem %s111_s25, 128 }
  0x18   : > { %p4481_p7 = pnand %p4134_p2, %p7077_p0  ;;  %p4488_p3 = pnand %p4147_p4, %p4450_p5 }
  0x19   : > { %s4109_s29 = sshll.u32 %s121_s27, 6  ;;  %p4265_p9 = scmp.ne.s32.totalorder %s111_s25, %s4264_s30 }
  0x1a   : > { %p4255_p8 = pneg %p4481_p7  ;;  %p4272_p12 = scmp.lt.s32.totalorder %s111_s25, %s111_s25 }
  0x1b   : > { %p4273_p11 = scmp.lt.s32.totalorder %s4264_s30, %s4264_s30 }
  0x1c   : > { %p4267_p10 = pnand %p4265_p9, %p4255_p8 }
  0x1d   : > { %p4274_p2 = por %p4273_p11, %p4272_p12 }
  0x1e   : > { %p4268_p1 = pneg %p4267_p10 }
  0x20   : > { %p4275_p0 = pnand %p4274_p2, %p4268_p1 }
  0x22   : > { %4278 = shalt.err (!%p4275_p0)
}
  0x23   : > { %4137 = dma.hbm_to_vmem [thread:$0]  (!%p4481_p7), %s6967_s1, 128, %s111_s25, [#allocation8]  }
  0x24   : > { %s4122_s5 = sshll.u32 %s4375_s12, 10  ;;  %s125_s6 = scalar_lea.vmem [#allocation4], %s4109_s29 }
  0x25   : > { %s132_s7 = sshll.u32 %s125_s6, 4  ;;  %s4503_s16 = scalar_lea.hbm %s6966_s0, %s4122_s5  ;;  %s4505_s7 = int_to_ptr.vmem [resolvable:$true] %s132_s7 }
  0x26   : > { %s4507_s17 = scalar_lea.sflag [#allocation5], %s121_s27  ;;  %s4279_s19 = scalar_lea.hbm %s4503_s16, 1024 }
  0x27   : > { %p4280_p4 = scmp.ne.s32.totalorder %s4503_s16, %s4279_s19  ;;  %p4281_p5 = pneg %p4488_p3 }
  0x28   : > { %s4284_s26 = scalar_lea.hbm %s6966_s0, 2048  ;;  %p4285_p1 = scmp.lt.s32.totalorder %s4503_s16, %s6966_s0 }
  0x29   : > { %p4282_p11 = pnand %p4281_p5, %p4280_p4  ;;  %p4286_p7 = scmp.lt.s32.totalorder %s4284_s26, %s4279_s19 }
  0x2b   : > { %p4283_p12 = pneg %p4282_p11  ;;  %p4287_p8 = por %p4286_p7, %p4285_p1 }
  0x2d   : > { %p4288_p9 = pnand %p4287_p8, %p4283_p12 }
  0x2f   : > { %4291 = shalt.err (!%p4288_p9)
}
  0x30   : > { %s4292_s27 = scalar_lea.vmem %s4505_s7, 1024  ;;  %s4378_s3 = smov [#allocation4]  }
  0x31   : > { %p4293_p10 = scmp.ne.s32.totalorder %s4505_s7, %s4292_s27  ;;  %s4297_s4 = sshll.u32 %s4378_s3, 4  ;;  %s4298_s4 = int_to_ptr.vmem [resolvable:$false] %s4297_s4 }
  0x32   : > { %s4299_s5 = scalar_lea.vmem %s4298_s4, 2048  ;;  %p4300_p4 = scmp.lt.s32.totalorder %s4505_s7, %s4298_s4 }
  0x33   : > { %p4295_p2 = pnand %p4293_p10, %p4281_p5  ;;  %p4301_p11 = scmp.lt.s32.totalorder %s4299_s5, %s4292_s27 }
  0x35   : > { %p4296_p0 = pneg %p4295_p2  ;;  %p4302_p6 = por %p4301_p11, %p4300_p4 }
  0x37   : > { %p4303_p13 = pnand %p4302_p6, %p4296_p0 }
  0x39   : > { %4306 = shalt.err (!%p4303_p13)
}
  0x3a   : > { %s4379_s6 = smov 128   ;;  %s4380_s8 = smov 8  }
  0x3b   : > { %4141 = dma.hbm_to_vmem [thread:$0]  (!%p4488_p3), %s4503_s16, 1024, %s4505_s7, %s4507_s17, %s4379_s6, %s4379_s6, %s4380_s8  }
  0x3c   : > { %p7080_p5 = scmp.ne.s32.totalorder %s7076_s23, 0 }
  0x3e   : > { %144 = sbr.rel (%p7080_p5) target bundleno = 931 (0x3a3), region = 28 }
  0x43   : > { %s4531_s14 = sand.u32 1, %s4367_s10   ;;  %p7081_p6 = scmp.ne.s32.totalorder %s7073_s20, 0 }
  0x44   : > { %s4113_s19 = sshll.u32 %s4531_s14, 6  ;;  %s147_s24 = scalar_lea.sflag [#allocation5], %s4531_s14 }
  0x45   : > { %s4535_s25 = scalar_lea.vmem [#allocation4], %s4113_s19 }
  0x46   : > { %4350 = dma.done.wait (%p7081_p6), %s147_s24, 1024  }
  0x47   : > { %4352 = vsyncadd (%p7081_p6), %s147_s24, 4294966272  ;;  %p7082_p13 = scmp.eq.s32.totalorder %s4432_s13, 0 }
  0x49   : > { %4354 = dma.done.wait (%p7082_p13), [#allocation8], 128   ;;  %p7083_p3 = pmov %p7082_p13 }
  0x4a   : > { %vm176_vm0 = vcmask 146432   ;;  %v4381_v0 = vmov 0.0   ;;  %vm179_vm1 = vcmask 140288   ;;  %vm190_vm2 = vcmask 139264   ;;  %v229_v1 = vld [vmem:[%s4535_s25 + $0x10] sm:$0xff]  ;;  %v227_v2 = vld [vmem:[%s4535_s25] sm:$0xff] }
  0x4b   : > { %4356 = vsyncadd (%p7083_p3), [#allocation8], 4294967168  ;;  %177 = vst.msk [vmem:[#allocation2 + $0x60] sm:$0xff] %vm176_vm0, %v4381_v0  ;;  %vm199_vm3 = vcmask 7168   ;;  %vm213_vm4 = vcmask 146568   ;;  %4001 = vmatprep.mubr.f32.mxu0 %v4381_v0  ;;  %vm202_vm5 = vcmask 1024   ;;  %v297_v5 = vlaneseq }
  0x4c   : > { %178 = vst.msk [vmem:[#allocation2 + $0x68] sm:$0xff] %vm176_vm0, %v4381_v0  ;;  %181 = vst.msk [vmem:[#allocation2 + $0x78] sm:$0xff] %vm176_vm0, %v4381_v0  ;;  %vm216_vm6 = vcmask 140424   ;;  %v4382_v3 = vmov 1983009808   ;;  %s4383_s20 = smov 1  }
  0x4d   : > { %182 = vst.msk [vmem:[#allocation2 + $0x80] sm:$0xff] %vm176_vm0, %v4381_v0  ;;  %184 = vst.msk [vmem:[#allocation2 + $0x90] sm:$0xff] %vm176_vm0, %v4381_v0  ;;  %v295_v4 = vunpack.c.l.s4 %v4382_v3  ;;  %247 = vrot.lane.b32.xlu1 %v229_v1, %s4383_s20  ;;  %243 = vrot.lane.b32.xlu0 %v227_v2, %s4383_s20  ;;  %v230_v6 = vld [vmem:[%s4535_s25 + $0x18] sm:$0xff]  ;;  %v228_v7 = vld [vmem:[%s4535_s25 + $0x8] sm:$0xff]  ;;  %v4579_v9 = vshrl.u32 %v297_v5, 7  ;;  %s4384_s23 = smov 127  }
  0x4e   : > { %185 = vst.msk [vmem:[#allocation2 + $0x98] sm:$0xff] %vm176_vm0, %v4381_v0  ;;  %187 = vst.msk [vmem:[#allocation2 + $0xa8] sm:$0xff] %vm176_vm0, %v4381_v0  ;;  %v232_v10 = vld [vmem:[%s4535_s25 + $0x28] sm:$0xff]  ;;  %v231_v11 = vld [vmem:[%s4535_s25 + $0x20] sm:$0xff]  ;;  %s4385_s28 = smov 126   ;;  %vm267_vm7 = vcmask 138248  }
  0x4f   : > { %188 = vst.msk [vmem:[#allocation2 + $0xb0] sm:$0xff] %vm176_vm0, %v4381_v0  ;;  %v296_v8 = vunpack.c.0.s8 %v295_v4  ;;  %7084 = vst [vmem:[#allocation13_spill] sm:$0xff] %v4579_v9  ;;  %v234_v20 = vld [vmem:[%s4535_s25 + $0x38] sm:$0xff]  ;;  %v233_v21 = vld [vmem:[%s4535_s25 + $0x30] sm:$0xff]  ;;  %s4387_s7 = smov 32   ;;  %s4388_s16 = smov 16  }
  0x50   : > { %180 = vst.msk [vmem:[#allocation2 + $0x70] sm:$0x3] %vm179_vm1, %v4381_v0  ;;  %183 = vst.msk [vmem:[#allocation2 + $0x88] sm:$0x3] %vm179_vm1, %v4381_v0  ;;  %s4389_s17 = smov 64   ;;  %s4390_s26 = smov 48  }
  0x51   : > { %186 = vst.msk [vmem:[#allocation2 + $0xa0] sm:$0x3] %vm179_vm1, %v4381_v0  ;;  %189 = vst.msk [vmem:[#allocation2 + $0xb8] sm:$0x3] %vm179_vm1, %v4381_v0  ;;  %249 = vrot.lane.b32.xlu1 %v230_v6, %s4383_s20  ;;  %245 = vrot.lane.b32.xlu0 %v228_v7, %s4383_s20  ;;  %v4590_v22 = vsub.s32 %v296_v8, %v4579_v9  ;;  %v4386_v7 = vmov 1934713408  }
  0x52   : > { %192 = vst.msk [vmem:[#allocation2 + $0x18] sm:$0x1] %vm190_vm2, %v4381_v0  ;;  %191 = vst.msk [vmem:[#allocation2] sm:$0x1] %vm190_vm2, %v4381_v0  ;;  %v651_v12 = vld [vmem:[#allocation2 + $0x60] sm:$0xff]  ;;  %v359_v8 = vunpack.c.l.s4 %v4386_v7  ;;  %s4391_s29 = smov 96  }
  0x53   : > { %205 = vst.msk [vmem:[#allocation2 + $0x20] sm:$0xff] %vm199_vm3, %v4381_v0  ;;  %201 = vst.msk [vmem:[#allocation2 + $0x8] sm:$0xff] %vm199_vm3, %v4381_v0  ;;  %v653_v13 = vld [vmem:[#allocation2 + $0x78] sm:$0xff]  ;;  %v4585_v15 = vld [vmem:[#allocation2 + $0x68] sm:$0xff]  ;;  %s4392_s30 = smov 80   ;;  %s4393_s27 = smov 112  }
  0x54   : > { %193 = vst.msk [vmem:[#allocation2 + $0x30] sm:$0x1] %vm190_vm2, %v4381_v0  ;;  %194 = vst.msk [vmem:[#allocation2 + $0x48] sm:$0x1] %vm190_vm2, %v4381_v0  ;;  %v655_v14 = vld [vmem:[#allocation2 + $0x90] sm:$0xff]  ;;  %v654_v16 = vld [vmem:[#allocation2 + $0x80] sm:$0xff] }
  0x55   : > { %195 = vst.msk [vmem:[#allocation2 + $0x11] sm:$0x1] %vm190_vm2, %v4381_v0  ;;  %196 = vst.msk [vmem:[#allocation2 + $0x29] sm:$0x1] %vm190_vm2, %v4381_v0  ;;  %v656_v17 = vld [vmem:[#allocation2 + $0x98] sm:$0xff]  ;;  %v657_v18 = vld [vmem:[#allocation2 + $0xa8] sm:$0xff]  ;;  %253 = vrot.lane.b32.xlu1 %v232_v10, %s4383_s20  ;;  %251 = vrot.lane.b32.xlu0 %v231_v11, %s4383_s20  ;;  %v324_v23 = vcombine.low %v651_v12, %v655_v14  ;;  %v325_v25 = vcombine.high %v651_v12, %v655_v14 }
  0x56   : > { %197 = vst.msk [vmem:[#allocation2 + $0x41] sm:$0x1] %vm190_vm2, %v4381_v0  ;;  %198 = vst.msk [vmem:[#allocation2 + $0x59] sm:$0x1] %vm190_vm2, %v4381_v0  ;;  %v658_v19 = vld [vmem:[#allocation2 + $0xb0] sm:$0xff]  ;;  %v340_v24 = vcombine.low %v653_v13, %v657_v18  ;;  %v341_v26 = vcombine.high %v653_v13, %v657_v18  ;;  %v460_v27 = vcombine.low %v4585_v15, %v656_v17  ;;  %v3491_v51 = vld [vmem:[#allocation2 + $0x62] sm:$0xff] }
  0x57   : > { %208 = vst.msk [vmem:[#allocation2 + $0x38] sm:$0xff] %vm199_vm3, %v4381_v0  ;;  %211 = vst.msk [vmem:[#allocation2 + $0x50] sm:$0xff] %vm199_vm3, %v4381_v0  ;;  %v476_v28 = vcombine.low %v654_v16, %v658_v19  ;;  %v4596_v29 = vrot.slane %v324_v23, %v4590_v22  ;;  %v4602_v31 = vrot.slane %v325_v25, %v4590_v22  ;;  %v3492_v47 = vld [vmem:[#allocation2 + $0x6a] sm:$0xff]  ;;  %v3494_v48 = vld [vmem:[#allocation2 + $0x82] sm:$0xff]  ;;  %vm620_vm9 = vcmask 130048   ;;  %s4115_s3 = sshll.u32 %s4531_s14, 4 }
  0x58   : > { %204 = vst.msk [vmem:[#allocation2 + $0x18] sm:$0xff] %vm199_vm3, %v4381_v0  ;;  %200 = vst.msk [vmem:[#allocation2] sm:$0xff] %vm199_vm3, %v4381_v0  ;;  %v4599_v30 = vrot.slane %v340_v24, %v4590_v22  ;;  %v4605_v32 = vrot.slane %v341_v26, %v4590_v22  ;;  %v4618_v37 = vrot.slane %v460_v27, %v4590_v22  ;;  %v3496_v49 = vld [vmem:[#allocation2 + $0x9a] sm:$0xff]  ;;  %v3498_v50 = vld [vmem:[#allocation2 + $0xb2] sm:$0xff]  ;;  %vm622_vm10 = vcmask 261120   ;;  %s174_s4 = scalar_lea.vmem [#allocation9], %s4115_s3 }
  0x59   : > { %219 = vst.msk [vmem:[#allocation2 + $0x20] sm:$0xff] %vm213_vm4, %v4381_v0  ;;  %215 = vst.msk [vmem:[#allocation2 + $0x8] sm:$0xff] %vm213_vm4, %v4381_v0  ;;  %257 = vrot.lane.b32.xlu1 %v234_v20, %s4383_s20  ;;  %255 = vrot.lane.b32.xlu0 %v233_v21, %s4383_s20  ;;  %v4621_v38 = vrot.slane %v476_v28, %v4590_v22  ;;  %v461_v39 = vcombine.high %v4585_v15, %v656_v17  ;;  %v4651_v52 = vld [vmem:[#allocation2 + $0x7a] sm:$0xff]  ;;  %v4656_v53 = vld [vmem:[#allocation2 + $0x92] sm:$0xff]  ;;  %vm624_vm11 = vcmask 392192   ;;  %vm626_vm12 = vcmask 523264  }
  0x5a   : > { %207 = vst.msk [vmem:[#allocation2 + $0x30] sm:$0xff] %vm199_vm3, %v4381_v0  ;;  %210 = vst.msk [vmem:[#allocation2 + $0x48] sm:$0xff] %vm199_vm3, %v4381_v0  ;;  %v389_v33 = vcombine.high %v4596_v29, %v4599_v30  ;;  %v388_v34 = vcombine.low %v4596_v29, %v4599_v30  ;;  %v404_v35 = vcombine.low %v4602_v31, %v4605_v32  ;;  %v4658_v54 = vld [vmem:[#allocation2 + $0xaa] sm:$0xff]  ;;  %vm628_vm13 = vcmask 654336   ;;  %s4025_s5 = sshll.u32 %s174_s4, 4  ;;  %s4123_s6 = sshll.u32 %s4432_s13, 8  ;;  %s6926_s5 = int_to_ptr.vmem [resolvable:$true] %s4025_s5 }
  0x5b   : > { %222 = vst.msk [vmem:[#allocation2 + $0x38] sm:$0xff] %vm213_vm4, %v4381_v0  ;;  %225 = vst.msk [vmem:[#allocation2 + $0x50] sm:$0xff] %vm213_vm4, %v4381_v0  ;;  %v477_v40 = vcombine.high %v654_v16, %v658_v19  ;;  %v524_v41 = vcombine.low %v4618_v37, %v4621_v38  ;;  %v4630_v42 = vrot.slane %v461_v39, %v4590_v22  ;;  %v4209_v7 = vld [vmem:[#allocation2 + $0x6a] ss:$48 sps:$4 sm:$0xff]   ;;  %vm630_vm14 = vcmask 785408   ;;  %s4023_s24 = scalar_lea.hbm %s6968_s2, %s4123_s6  ;;  %s4011_s25 = scalar_lea.sflag [#allocation6], %s4531_s14 }
  0x5c   : > { %206 = vst.msk [vmem:[#allocation2 + $0x28] sm:$0x3] %vm202_vm5, %v4381_v0  ;;  %203 = vst.msk [vmem:[#allocation2 + $0x10] sm:$0x3] %vm202_vm5, %v4381_v0  ;;  %vm632_vm15 = vcmask 916480   ;;  %s4307_s20 = scalar_lea.vmem %s6926_s5, 256 }
  0x5d   : > { %209 = vst.msk [vmem:[#allocation2 + $0x40] sm:$0x3] %vm202_vm5, %v4381_v0  ;;  %212 = vst.msk [vmem:[#allocation2 + $0x58] sm:$0x3] %vm202_vm5, %v4381_v0  ;;  %691 = vrot.lane.b32.xlu0 %v651_v12, %s4384_s23  ;;  %693 = vrot.lane.b32.xlu1 %v4585_v15, %s4384_s23  ;;  %v4633_v43 = vrot.slane %v477_v40, %v4590_v22  ;;  %p4308_p12 = scmp.ne.s32.totalorder %s6926_s5, %s4307_s20  ;;  %p7359_p1 = scmp.ne.s32.totalorder %s7074_s21, 0 }
  0x5e   : > { %218 = vst.msk [vmem:[#allocation2 + $0x18] sm:$0xff] %vm213_vm4, %v4381_v0  ;;  %214 = vst.msk [vmem:[#allocation2] sm:$0xff] %vm213_vm4, %v4381_v0  ;;  %s4395_s13 = smov [#allocation9]  }
  0x5f   : > { %221 = vst.msk [vmem:[#allocation2 + $0x30] sm:$0xff] %vm213_vm4, %v4381_v0  ;;  %224 = vst.msk [vmem:[#allocation2 + $0x48] sm:$0xff] %vm213_vm4, %v4381_v0  ;;  %v540_v45 = vcombine.low %v4630_v42, %v4633_v43  ;;  %v541_v46 = vcombine.high %v4630_v42, %v4633_v43  ;;  %p4309_p7 = pnand %p4308_p12, %p7359_p1 }
  0x60   : > { %220 = vst.msk [vmem:[#allocation2 + $0x28] sm:$0x3] %vm216_vm6, %v4381_v0  ;;  %217 = vst.msk [vmem:[#allocation2 + $0x10] sm:$0x3] %vm216_vm6, %v4381_v0 }
  0x61   : > { %223 = vst.msk [vmem:[#allocation2 + $0x40] sm:$0x3] %vm216_vm6, %v4381_v0  ;;  %226 = vst.msk [vmem:[#allocation2 + $0x58] sm:$0x3] %vm216_vm6, %v4381_v0  ;;  %695 = vrot.lane.b32.xlu0 %v653_v13, %s4384_s23  ;;  %697 = vrot.lane.b32.xlu1 %v654_v16, %s4384_s23  ;;  %v360_v13 = vunpack.c.0.s8 %v359_v8  ;;  %v4211_v8 = vld [vmem:[#allocation2 + $0x82] ss:$48 sps:$4 sm:$0xff]   ;;  %p4310_p8 = pneg %p4309_p7 }
  0x63   : > { %v4723_v20 = vsub.s32 %v360_v13, %v4579_v9 }
  0x65   : > { %699 = vrot.lane.b32.xlu0 %v655_v14, %s4384_s23  ;;  %701 = vrot.lane.b32.xlu1 %v656_v17, %s4384_s23  ;;  %v4745_v39 = vrot.slane %v540_v45, %v4723_v20  ;;  %v412_v30 = vrot.slane %v404_v35, %v4723_v20 }
  0x69   : > { %703 = vrot.lane.b32.xlu0 %v657_v18, %s4384_s23  ;;  %705 = vrot.lane.b32.xlu1 %v658_v19, %s4384_s23 }
  0x6d   : > { %3533 = vrot.lane.b32.xlu1 %v3492_v47, %s4385_s28  ;;  %3537 = vrot.lane.b32.xlu0 %v3494_v48, %s4385_s28 }
  0x71   : > { %3541 = vrot.lane.b32.xlu1 %v3496_v49, %s4385_s28  ;;  %3545 = vrot.lane.b32.xlu0 %v3498_v50, %s4385_s28 }
  0x75   : > { %3531 = vrot.lane.b32.xlu1 %v3491_v51, %s4385_s28  ;;  %3535 = vrot.lane.b32.xlu0 %v4651_v52, %s4385_s28 }
  0x79   : > { %3539 = vrot.lane.b32.xlu1 %v4656_v53, %s4385_s28  ;;  %3543 = vrot.lane.b32.xlu0 %v4658_v54, %s4385_s28 }
  0x7d   : > { %3109 = vrot.lane.b32.xlu1 %v3492_v47, %s4384_s23  ;;  %3113 = vrot.lane.b32.xlu0 %v3494_v48, %s4384_s23  ;;  %v4754_v47 = vrot.slane %v388_v34, %v4723_v20  ;;  %v4768_v34 = vrot.slane %v541_v46, %v4723_v20 }
  0x7f   : > { %7086 = vst [vmem:[#allocation15_spill] sm:$0xff] %v4754_v47 }
  0x81   : > { %3117 = vrot.lane.b32.xlu1 %v3496_v49, %s4384_s23  ;;  %3121 = vrot.lane.b32.xlu0 %v3498_v50, %s4384_s23 }
  0x85   : > { %3107 = vrot.lane.b32.xlu1 %v3491_v51, %s4384_s23 }
  0xbf   : > { %v248_v55 = vpop.permute.xlu1 %247  ;;  %v244_v56 = vpop.permute.xlu0 %243 }
  0xc0   : > { %270 = vst.msk [vmem:[#allocation2 + $0x19] sm:$0xff] %vm267_vm7, %v248_v55  ;;  %268 = vst.msk [vmem:[#allocation2 + $0x1] sm:$0xff] %vm267_vm7, %v244_v56 }
  0xc3   : > { %v250_v57 = vpop.permute.xlu1 %249  ;;  %v246_v58 = vpop.permute.xlu0 %245 }
  0xc4   : > { %271 = vst.msk [vmem:[#allocation2 + $0x21] sm:$0xff] %vm267_vm7, %v250_v57  ;;  %269 = vst.msk [vmem:[#allocation2 + $0x9] sm:$0xff] %vm267_vm7, %v246_v58 }
  0xc7   : > { %v254_v59 = vpop.permute.xlu1 %253  ;;  %v252_v60 = vpop.permute.xlu0 %251  ;;  %v4673_v61 = vld [vmem:[#allocation2] sm:$0xff]  ;;  %v4679_v62 = vld [vmem:[#allocation2 + $0x18] sm:$0xff] }
  0xc8   : > { %273 = vst.msk [vmem:[#allocation2 + $0x39] sm:$0xff] %vm267_vm7, %v254_v59  ;;  %272 = vst.msk [vmem:[#allocation2 + $0x31] sm:$0xff] %vm267_vm7, %v252_v60  ;;  %675 = vrot.lane.b32.xlu0 %v4673_v61, %s4384_s23  ;;  %v4779_v60 = vrot.slane %v524_v41, %v4723_v20 }
  0xca   : > { %7088 = vst [vmem:[#allocation17_spill] sm:$0xff] %v4779_v60 }
  0xcb   : > { %v258_v63 = vpop.permute.xlu1 %257  ;;  %v256_v0 = vpop.permute.xlu0 %255  ;;  %v644_v1 = vld [vmem:[#allocation2 + $0x8] sm:$0xff]  ;;  %v646_v2 = vld [vmem:[#allocation2 + $0x20] sm:$0xff] }
  0xcc   : > { %275 = vst.msk [vmem:[#allocation2 + $0x51] sm:$0xff] %vm267_vm7, %v258_v63  ;;  %274 = vst.msk [vmem:[#allocation2 + $0x49] sm:$0xff] %vm267_vm7, %v256_v0  ;;  %677 = vrot.lane.b32.xlu1 %v644_v1, %s4384_s23  ;;  %679 = vrot.lane.b32.xlu0 %v4679_v62, %s4384_s23  ;;  %v3484_v48 = vld [vmem:[#allocation2 + $0xa] sm:$0xff]  ;;  %v3486_v49 = vld [vmem:[#allocation2 + $0x22] sm:$0xff] }
  0xcd   : > { %v3483_v46 = vld [vmem:[#allocation2 + $0x2] sm:$0xff]  ;;  %v3485_v0 = vld [vmem:[#allocation2 + $0x1a] sm:$0xff] }
  0xcf   : > { %v4686_v3 = vld [vmem:[#allocation2 + $0x30] sm:$0xff]  ;;  %v4691_v4 = vld [vmem:[#allocation2 + $0x38] sm:$0xff] }
  0xd0   : > { %681 = vrot.lane.b32.xlu1 %v646_v2, %s4384_s23  ;;  %683 = vrot.lane.b32.xlu0 %v4686_v3, %s4384_s23  ;;  %v292_v12 = vcombine.low %v4673_v61, %v4686_v3  ;;  %v429_v14 = vcombine.high %v644_v1, %v4691_v4  ;;  %v428_v21 = vcombine.low %v644_v1, %v4691_v4  ;;  %v3488_v57 = vld [vmem:[#allocation2 + $0x3a] sm:$0xff]  ;;  %v3487_v41 = vld [vmem:[#allocation2 + $0x32] sm:$0xff] }
  0xd2   : > { %v4720_v19 = vrot.slane %v292_v12, %v4590_v22  ;;  %v443_v23 = vrot.slane %v429_v14, %v4590_v22  ;;  %v4736_v27 = vrot.slane %v428_v21, %v4590_v22  ;;  %v4233_v14 = vld [vmem:[#allocation2 + $0x69] ss:$48 sps:$4 sm:$0xff]   ;;  %v4799_v21 = vrot.slane %v4209_v7, %v4590_v22 }
  0xd3   : > { %v4693_v5 = vld [vmem:[#allocation2 + $0x48] sm:$0xff]  ;;  %v4699_v6 = vld [vmem:[#allocation2 + $0x50] sm:$0xff]  ;;  %v293_v7 = vcombine.high %v4673_v61, %v4686_v3 }
  0xd4   : > { %685 = vrot.lane.b32.xlu1 %v4691_v4, %s4384_s23  ;;  %687 = vrot.lane.b32.xlu0 %v4693_v5, %s4384_s23  ;;  %v308_v10 = vcombine.low %v4679_v62, %v4693_v5  ;;  %v445_v11 = vcombine.high %v646_v2, %v4699_v6  ;;  %v444_v17 = vcombine.low %v646_v2, %v4699_v6  ;;  %v3490_v58 = vld [vmem:[#allocation2 + $0x52] sm:$0xff]  ;;  %v4215_v13 = vld [vmem:[#allocation2 + $0x1a] ss:$48 sps:$4 sm:$0xff]  }
  0xd5   : > { %v4207_v12 = vld [vmem:[#allocation2 + $0x22] ss:$48 sps:$4 sm:$0xff]   ;;  %7089 = vst [vmem:[#allocation18_spill] sm:$0xff] %v4799_v21 }
  0xd6   : > { %v4712_v16 = vrot.slane %v308_v10, %v4590_v22  ;;  %v459_v18 = vrot.slane %v445_v11, %v4590_v22  ;;  %v4730_v25 = vrot.slane %v444_v17, %v4590_v22  ;;  %v4217_v10 = vld [vmem:[#allocation2 + $0x62] ss:$48 sps:$4 sm:$0xff]   ;;  %v4219_v11 = vld [vmem:[#allocation2 + $0x7a] ss:$48 sps:$4 sm:$0xff]  }
  0xd7   : > { %v4235_v17 = vld [vmem:[#allocation2 + $0x81] ss:$48 sps:$4 sm:$0xff]  }
  0xd8   : > { %689 = vrot.lane.b32.xlu1 %v4699_v6, %s4384_s23  ;;  %1099 = vrot.lane.b32.xlu0 %v4673_v61, %s4385_s28  ;;  %v356_v24 = vcombine.low %v4720_v19, %v4712_v16  ;;  %v508_v26 = vcombine.low %v443_v23, %v459_v18  ;;  %v492_v50 = vcombine.low %v4736_v27, %v4730_v25  ;;  %v4243_v61 = vld [vmem:[#allocation2 + $0x79] ss:$48 sps:$4 sm:$0xff]  }
  0xd9   : > { %v509_v55 = vcombine.high %v443_v23, %v459_v18  ;;  %v4205_v18 = vld [vmem:[#allocation2 + $0xa] ss:$48 sps:$4 sm:$0xff]   ;;  %v4213_v23 = vld [vmem:[#allocation2 + $0x2] ss:$48 sps:$4 sm:$0xff]   ;;  %v4860_v43 = vrot.slane %v4243_v61, %v4590_v22 }
  0xda   : > { %v4739_v28 = vrot.slane %v508_v26, %v4723_v20  ;;  %v4748_v40 = vrot.slane %v356_v24, %v4723_v20  ;;  %v4773_v59 = vrot.slane %v492_v50, %v4723_v20  ;;  %v309_v24 = vcombine.high %v4679_v62, %v4693_v5 }
  0xdb   : > { %v4782_v63 = vrot.slane %v509_v55, %v4723_v20  ;;  %v4804_v26 = vrot.slane %v4211_v8, %v4590_v22  ;;  %v4807_v50 = vrot.slane %v4217_v10, %v4590_v22  ;;  %v4810_v55 = vrot.slane %v4219_v11, %v4590_v22  ;;  %v4241_v10 = vld [vmem:[#allocation2 + $0x61] ss:$48 sps:$4 sm:$0xff]   ;;  %7102 = vst [vmem:[#allocation31_spill] sm:$0xff] %v4860_v43 }
  0xdc   : > { %1101 = vrot.lane.b32.xlu1 %v644_v1, %s4385_s28  ;;  %1103 = vrot.lane.b32.xlu0 %v4679_v62, %s4385_s28  ;;  %7085 = vst [vmem:[#allocation14_spill] sm:$0xff] %v4748_v40  ;;  %7087 = vst [vmem:[#allocation16_spill] sm:$0xff] %v4773_v59  ;;  %v4821_v62 = vrot.slane %v4233_v14, %v4590_v22  ;;  %v4824_v8 = vrot.slane %v4235_v17, %v4590_v22  ;;  %v4231_v1 = vld [vmem:[#allocation2 + $0x21] ss:$48 sps:$4 sm:$0xff]  }
  0xdd   : > { %7090 = vst [vmem:[#allocation19_spill] sm:$0xff] %v4804_v26  ;;  %7091 = vst [vmem:[#allocation20_spill] sm:$0xff] %v4807_v50  ;;  %v4829_v11 = vrot.slane %v4205_v18, %v4590_v22  ;;  %v2947_v14 = vcombine.low %v4799_v21, %v4804_v26  ;;  %v2811_v17 = vcombine.low %v4807_v50, %v4810_v55 }
  0xde   : > { %7092 = vst [vmem:[#allocation21_spill] sm:$0xff] %v4810_v55  ;;  %7095 = vst [vmem:[#allocation24_spill] sm:$0xff] %v4821_v62  ;;  %v4849_v56 = vrot.slane %v4241_v10, %v4590_v22 }
  0xdf   : > { %7096 = vst [vmem:[#allocation25_spill] sm:$0xff] %v4824_v8  ;;  %7097 = vst [vmem:[#allocation26_spill] sm:$0xff] %v4829_v11  ;;  %v4867_v42 = vrot.slane %v2947_v14, %v4723_v20 }
  0xe0   : > { %1105 = vrot.lane.b32.xlu1 %v646_v2, %s4385_s28  ;;  %1107 = vrot.lane.b32.xlu0 %v4686_v3, %s4385_s28  ;;  %v3489_v2 = vld [vmem:[#allocation2 + $0x4a] sm:$0xff]  ;;  %v323_v3 = vrot.slane %v309_v24, %v4590_v22  ;;  %v1739_v24 = vcombine.low %v4821_v62, %v4824_v8  ;;  %7099 = vst [vmem:[#allocation28_spill] sm:$0xff] %v4849_v56 }
  0xe1   : > { %7103 = vst [vmem:[#allocation32_spill] sm:$0xff] %v4867_v42 }
  0xe4   : > { %3517 = vrot.lane.b32.xlu1 %v3484_v48, %s4385_s28  ;;  %3521 = vrot.lane.b32.xlu0 %v3486_v49, %s4385_s28 }
  0xe8   : > { %3525 = vrot.lane.b32.xlu1 %v3488_v57, %s4385_s28  ;;  %3529 = vrot.lane.b32.xlu0 %v3490_v58, %s4385_s28 }
  0xec   : > { %3515 = vrot.lane.b32.xlu1 %v3483_v46, %s4385_s28  ;;  %3519 = vrot.lane.b32.xlu0 %v3485_v0, %s4385_s28 }
  0xf0   : > { %3523 = vrot.lane.b32.xlu1 %v3487_v41, %s4385_s28  ;;  %3527 = vrot.lane.b32.xlu0 %v3489_v2, %s4385_s28 }
  0xf4   : > { %3093 = vrot.lane.b32.xlu1 %v3484_v48, %s4384_s23  ;;  %3097 = vrot.lane.b32.xlu0 %v3486_v49, %s4384_s23  ;;  %v4813_v48 = vrot.slane %v4207_v12, %v4590_v22  ;;  %v4816_v49 = vrot.slane %v4215_v13, %v4590_v22  ;;  %v4832_v12 = vrot.slane %v4213_v23, %v4590_v22  ;;  %v4229_v13 = vld [vmem:[#allocation2 + $0x9] ss:$48 sps:$4 sm:$0xff]  }
  0xf5   : > { %v307_v23 = vrot.slane %v293_v7, %v4590_v22  ;;  %v403_v7 = vrot.slane %v389_v33, %v4723_v20  ;;  %v4887_v33 = vpop.permute.xlu1 %693 }
  0xf6   : > { %7093 = vst [vmem:[#allocation22_spill] sm:$0xff] %v4813_v48  ;;  %7094 = vst [vmem:[#allocation23_spill] sm:$0xff] %v4816_v49  ;;  %v2779_v18 = vcombine.low %v4832_v12, %v4816_v49 }
  0xf7   : > { %7098 = vst [vmem:[#allocation27_spill] sm:$0xff] %v4832_v12  ;;  %v372_v10 = vcombine.low %v307_v23, %v323_v3  ;;  %v373_v14 = vcombine.high %v307_v23, %v323_v3  ;;  %v421_v3 = vcombine.high %v4748_v40, %v4754_v47  ;;  %v4906_v23 = vpop.permute.xlu0 %691  ;;  %v5037_v40 = vld [vmem:[#allocation2 + $0x61] sm:$0xff] }
  0xf8   : > { %3101 = vrot.lane.b32.xlu1 %v3488_v57, %s4384_s23  ;;  %3105 = vrot.lane.b32.xlu0 %v3490_v58, %s4384_s23  ;;  %v357_v57 = vcombine.high %v4720_v19, %v4712_v16  ;;  %v2915_v58 = vcombine.low %v4829_v11, %v4813_v48  ;;  %v4854_v16 = vrot.slane %v4229_v13, %v4590_v22  ;;  %v4239_v13 = vld [vmem:[#allocation2 + $0x19] ss:$48 sps:$4 sm:$0xff]  }
  0xf9   : > { %v4857_v19 = vrot.slane %v4231_v1, %v4590_v22  ;;  %v4877_v61 = vrot.slane %v2779_v18, %v4723_v20  ;;  %v4924_v44 = vpop.permute.xlu1 %697  ;;  %v387_v36 = vrot.slane %v373_v14, %v4723_v20  ;;  %v493_v14 = vcombine.high %v4736_v27, %v4730_v25 }
  0xfa   : > { %7100 = vst [vmem:[#allocation29_spill] sm:$0xff] %v4854_v16  ;;  %v371_v1 = vrot.slane %v357_v57, %v4723_v20  ;;  %v4874_v51 = vrot.slane %v2915_v58, %v4723_v20  ;;  %v1603_v57 = vcombine.low %v4849_v56, %v4860_v43  ;;  %v380_v58 = vrot.slane %v372_v10, %v4723_v20  ;;  %v5047_v56 = vld [vmem:[#allocation2 + $0x91] sm:$0xff]  ;;  %v5049_v43 = vld [vmem:[#allocation2 + $0x79] sm:$0xff] }
  0xfb   : > { %7101 = vst [vmem:[#allocation30_spill] sm:$0xff] %v4857_v19  ;;  %7106 = vst [vmem:[#allocation35_spill] sm:$0xff] %v4877_v61  ;;  %v1707_v29 = vcombine.low %v4854_v16, %v4857_v19  ;;  %v7114_v25 = vcombine.high %v4618_v37, %v4621_v38  ;;  %v7116_v37 = vcombine.high %v4739_v28, %v4745_v39  ;;  %v5059_v16 = vld [vmem:[#allocation2 + $0xa9] sm:$0xff] }
  0xfc   : > { %3091 = vrot.lane.b32.xlu1 %v3483_v46, %s4384_s23  ;;  %3095 = vrot.lane.b32.xlu0 %v3485_v0, %s4384_s23  ;;  %v4870_v46 = vrot.slane %v2811_v17, %v4723_v20  ;;  %v4237_v0 = vld [vmem:[#allocation2 + $0x1] ss:$48 sps:$4 sm:$0xff]   ;;  %7105 = vst [vmem:[#allocation34_spill] sm:$0xff] %v4874_v51  ;;  %v4890_v17 = vrot.slane %v1739_v24, %v4723_v20 }
  0xfd   : > { %v4896_v18 = vrot.slane %v1707_v29, %v4723_v20  ;;  %v4899_v35 = vrot.slane %v4237_v0, %v4590_v22  ;;  %v424_v45 = vcombine.low %v380_v58, %v412_v30  ;;  %v423_v10 = vcombine.high %v371_v1, %v403_v7 }
  0xfe   : > { %7104 = vst [vmem:[#allocation33_spill] sm:$0xff] %v4870_v46  ;;  %7107 = vst [vmem:[#allocation36_spill] sm:$0xff] %v4890_v17  ;;  %v539_v27 = vrot.slane %v7114_v25, %v4723_v20  ;;  %v7117_v38 = vcombine.low %v4739_v28, %v4745_v39  ;;  %v2276_v39 = vld [vmem:[#allocation2 + $0x9] sm:$0xff]  ;;  %v2278_v25 = vld [vmem:[#allocation2 + $0x21] sm:$0xff] }
  0xff   : > { %7108 = vst [vmem:[#allocation37_spill] sm:$0xff] %v4896_v18  ;;  %7109 = vst [vmem:[#allocation38_spill] sm:$0xff] %v4899_v35 }
 0x100   : > { %3099 = vrot.lane.b32.xlu1 %v3487_v41, %s4384_s23  ;;  %3103 = vrot.lane.b32.xlu0 %v3489_v2, %s4384_s23  ;;  %v4902_v41 = vrot.slane %v4239_v13, %v4590_v22  ;;  %v422_v2 = vcombine.low %v371_v1, %v403_v7  ;;  %v4920_v13 = vrot.slane %v1603_v57, %v4723_v20  ;;  %v4933_v57 = vpop.permute.xlu0 %695 }
 0x102   : > { %7110 = vst [vmem:[#allocation39_spill] sm:$0xff] %v4902_v41  ;;  %v1571_v29 = vcombine.low %v4899_v35, %v4902_v41  ;;  %7112 = vst [vmem:[#allocation41_spill] sm:$0xff] %v4920_v13  ;;  %v5041_v41 = vld [vmem:[#allocation2 + $0x49] sm:$0xff] }
 0x104   : > { %569 = vrot.lane.b32.xlu1 %v422_v2, %s4387_s7  ;;  %565 = vrot.lane.b32.xlu0 %v421_v3, %s4388_s16  ;;  %v4917_v0 = vrot.slane %v1571_v29, %v4723_v20  ;;  %v7113_v2 = vcombine.high %v4602_v31, %v4605_v32  ;;  %v425_v29 = vcombine.high %v380_v58, %v412_v30  ;;  %v4941_v31 = vpop.permute.xlu1 %701  ;;  %v4943_v32 = vpop.permute.xlu0 %699 }
 0x105   : > { %v755_v8 = vcombine.low %v4906_v23, %v4943_v32 }
 0x106   : > { %7111 = vst [vmem:[#allocation40_spill] sm:$0xff] %v4917_v0  ;;  %v419_v3 = vrot.slane %v7113_v2, %v4723_v20  ;;  %v507_v2 = vrot.slane %v493_v14, %v4723_v20  ;;  %v7119_v14 = vcombine.high %v4782_v63, %v4768_v34 }
 0x107   : > { %v5079_v55 = vrot.slane %v755_v8, %v4590_v22 }
 0x108   : > { %577 = vrot.lane.b32.xlu1 %v424_v45, %s4389_s17  ;;  %573 = vrot.lane.b32.xlu0 %v423_v10, %s4390_s26  ;;  %v426_v1 = vcombine.low %v387_v36, %v419_v3  ;;  %v557_v45 = vcombine.high %v4773_v59, %v4779_v60  ;;  %v427_v10 = vcombine.high %v387_v36, %v419_v3  ;;  %v4954_v30 = vpop.permute.xlu1 %705  ;;  %v5027_v60 = vld [vmem:[#allocation2 + $0x31] sm:$0xff]  ;;  %v5029_v59 = vld [vmem:[#allocation2 + $0x19] sm:$0xff] }
 0x109   : > { %v559_v58 = vcombine.high %v507_v2, %v539_v27  ;;  %v907_v61 = vcombine.low %v4924_v44, %v4954_v30 }
 0x10c   : > { %585 = vrot.lane.b32.xlu1 %v426_v1, %s4391_s29  ;;  %581 = vrot.lane.b32.xlu0 %v425_v29, %s4392_s30  ;;  %v558_v1 = vcombine.low %v507_v2, %v539_v27  ;;  %v4956_v29 = vpop.permute.xlu0 %703  ;;  %v4960_v36 = vpop.permute.xlu1 %3533  ;;  %v2284_v27 = vld [vmem:[#allocation2 + $0x69] sm:$0xff] }
 0x10d   : > { %7115 = vst [vmem:[#allocation42_spill] sm:$0xff] %v4960_v36  ;;  %v771_v18 = vcombine.low %v4933_v57, %v4956_v29 }
 0x10f   : > { %v5082_v12 = vrot.slane %v771_v18, %v4590_v22 }
 0x110   : > { %593 = vrot.lane.b32.xlu1 %v557_v45, %s4388_s16  ;;  %589 = vrot.lane.b32.xlu0 %v427_v10, %s4393_s27  ;;  %v4970_v3 = vpop.permute.xlu0 %3537  ;;  %v7120_v45 = vcombine.low %v4782_v63, %v4768_v34  ;;  %v4980_v10 = vpop.permute.xlu1 %3541  ;;  %v2280_v63 = vld [vmem:[#allocation2 + $0x39] sm:$0xff] }
 0x111   : > { %7118 = vst [vmem:[#allocation43_spill] sm:$0xff] %v4970_v3  ;;  %7121 = vst [vmem:[#allocation44_spill] sm:$0xff] %v4980_v10  ;;  %v819_v11 = vcombine.low %v5079_v55, %v5082_v12 }
 0x113   : > { %v5132_v42 = vrot.slane %v819_v11, %v4723_v20 }
 0x114   : > { %601 = vrot.lane.b32.xlu1 %v559_v58, %s4390_s26  ;;  %597 = vrot.lane.b32.xlu0 %v558_v1, %s4387_s7  ;;  %v4982_v2 = vpop.permute.xlu0 %3545  ;;  %v4988_v28 = vpop.permute.xlu1 %3531  ;;  %v2282_v58 = vld [vmem:[#allocation2 + $0x51] sm:$0xff]  ;;  %v5003_v1 = vld [vmem:[#allocation2 + $0x99] sm:$0xff] }
 0x115   : > { %7122 = vst [vmem:[#allocation45_spill] sm:$0xff] %v4982_v2  ;;  %7123 = vst [vmem:[#allocation46_spill] sm:$0xff] %v4988_v28 }
 0x116   : > { %7135 = vst [vmem:[#allocation58_spill] sm:$0xff] %v5132_v42 }
 0x118   : > { %609 = vrot.lane.b32.xlu1 %v7116_v37, %s4392_s30  ;;  %605 = vrot.lane.b32.xlu0 %v7117_v38, %s4389_s17  ;;  %v4993_v34 = vpop.permute.xlu0 %3535 }
 0x119   : > { %7124 = vst [vmem:[#allocation47_spill] sm:$0xff] %v4993_v34 }
 0x11c   : > { %617 = vrot.lane.b32.xlu1 %v7119_v14, %s4393_s27  ;;  %613 = vrot.lane.b32.xlu0 %v7120_v45, %s4391_s29  ;;  %v5015_v14 = vld [vmem:[#allocation2 + $0xb1] sm:$0xff]  ;;  %v5017_v45 = vld [vmem:[#allocation2 + $0x1] sm:$0xff] }
 0x120   : > { %3115 = vrot.lane.b32.xlu1 %v4656_v53, %s4384_s23  ;;  %3111 = vrot.lane.b32.xlu0 %v4651_v52, %s4384_s23  ;;  %v4997_v53 = vpop.permute.xlu1 %3539  ;;  %v4999_v52 = vpop.permute.xlu0 %3543 }
 0x121   : > { %7125 = vst [vmem:[#allocation48_spill] sm:$0xff] %v4997_v53  ;;  %7126 = vst [vmem:[#allocation49_spill] sm:$0xff] %v4999_v52 }
 0x124   : > { %2309 = vrot.lane.b32.xlu1 %v2276_v39, %s4385_s28  ;;  %3119 = vrot.lane.b32.xlu0 %v4658_v54, %s4384_s23  ;;  %v5005_v54 = vld [vmem:[#allocation2 + $0x81] sm:$0xff]  ;;  %v5007_v37 = vpop.permute.xlu1 %3109  ;;  %v5009_v38 = vpop.permute.xlu0 %3113 }
 0x125   : > { %7127 = vst [vmem:[#allocation50_spill] sm:$0xff] %v5007_v37  ;;  %7128 = vst [vmem:[#allocation51_spill] sm:$0xff] %v5009_v38 }
 0x128   : > { %2317 = vrot.lane.b32.xlu1 %v2280_v63, %s4385_s28  ;;  %2313 = vrot.lane.b32.xlu0 %v2278_v25, %s4385_s28  ;;  %v5019_v7 = vpop.permute.xlu1 %3117  ;;  %v5025_v24 = vpop.permute.xlu0 %3121 }
 0x129   : > { %7129 = vst [vmem:[#allocation52_spill] sm:$0xff] %v5019_v7  ;;  %7130 = vst [vmem:[#allocation53_spill] sm:$0xff] %v5025_v24 }
 0x12c   : > { %2325 = vrot.lane.b32.xlu1 %v2284_v27, %s4385_s28  ;;  %2321 = vrot.lane.b32.xlu0 %v2282_v58, %s4385_s28  ;;  %v5035_v47 = vpop.permute.xlu1 %3107 }
 0x130   : > { %2333 = vrot.lane.b32.xlu1 %v5003_v1, %s4385_s28  ;;  %2329 = vrot.lane.b32.xlu0 %v5005_v54, %s4385_s28 }
 0x134   : > { %2307 = vrot.lane.b32.xlu1 %v5017_v45, %s4385_s28  ;;  %2337 = vrot.lane.b32.xlu0 %v5015_v14, %s4385_s28 }
 0x138   : > { %2315 = vrot.lane.b32.xlu1 %v5027_v60, %s4385_s28  ;;  %2311 = vrot.lane.b32.xlu0 %v5029_v59, %s4385_s28 }
 0x13a   : > { %v5039_v35 = vpop.permute.xlu0 %675 }
 0x13c   : > { %2323 = vrot.lane.b32.xlu1 %v5037_v40, %s4385_s28  ;;  %2319 = vrot.lane.b32.xlu0 %v5041_v41, %s4385_s28 }
 0x13e   : > { %v5051_v0 = vpop.permute.xlu1 %677  ;;  %v5053_v13 = vpop.permute.xlu0 %679 }
 0x140   : > { %2331 = vrot.lane.b32.xlu1 %v5047_v56, %s4385_s28  ;;  %2327 = vrot.lane.b32.xlu0 %v5049_v43, %s4385_s28 }
 0x142   : > { %v5061_v19 = vpop.permute.xlu1 %681  ;;  %v5063_v62 = vpop.permute.xlu0 %683 }
 0x143   : > { %v723_v17 = vcombine.low %v5039_v35, %v5063_v62 }
 0x144   : > { %1885 = vrot.lane.b32.xlu1 %v2276_v39, %s4384_s23  ;;  %2335 = vrot.lane.b32.xlu0 %v5059_v16, %s4385_s28  ;;  %v891_v39 = vcombine.low %v4887_v33, %v4941_v31 }
 0x145   : > { %v5093_v46 = vrot.slane %v723_v17, %v4590_v22  ;;  %v5112_v17 = vrot.slane %v907_v61, %v4590_v22 }
 0x146   : > { %v5074_v9 = vpop.permute.xlu1 %685  ;;  %v5076_v50 = vpop.permute.xlu0 %687 }
 0x147   : > { %v739_v49 = vcombine.low %v5053_v13, %v5076_v50  ;;  %v859_v18 = vcombine.low %v5051_v0, %v5074_v9 }
 0x148   : > { %1893 = vrot.lane.b32.xlu1 %v2280_v63, %s4384_s23  ;;  %1889 = vrot.lane.b32.xlu0 %v2278_v25, %s4384_s23  ;;  %v5109_v25 = vrot.slane %v891_v39, %v4590_v22 }
 0x149   : > { %v5096_v8 = vrot.slane %v739_v49, %v4590_v22  ;;  %v5122_v48 = vrot.slane %v859_v18, %v4590_v22 }
 0x14a   : > { %v5100_v21 = vpop.permute.xlu1 %689  ;;  %v5102_v26 = vpop.permute.xlu0 %1099 }
 0x14b   : > { %7131 = vst [vmem:[#allocation54_spill] sm:$0xff] %v5102_v26  ;;  %v787_v63 = vcombine.low %v5093_v46, %v5096_v8  ;;  %v875_v49 = vcombine.low %v5061_v19, %v5100_v21 }
 0x14c   : > { %1901 = vrot.lane.b32.xlu1 %v2284_v27, %s4384_s23  ;;  %1897 = vrot.lane.b32.xlu0 %v2282_v58, %s4384_s23  ;;  %v955_v27 = vcombine.low %v5109_v25, %v5112_v17 }
 0x14d   : > { %v5119_v26 = vrot.slane %v787_v63, %v4723_v20  ;;  %v5125_v51 = vrot.slane %v875_v49, %v4590_v22 }
 0x14e   : > { %v5127_v39 = vpop.permute.xlu1 %1101  ;;  %v5129_v61 = vpop.permute.xlu0 %1103 }
 0x14f   : > { %7132 = vst [vmem:[#allocation55_spill] sm:$0xff] %v5119_v26  ;;  %7133 = vst [vmem:[#allocation56_spill] sm:$0xff] %v5127_v39  ;;  %v923_v58 = vcombine.low %v5122_v48, %v5125_v51 }
 0x150   : > { %7134 = vst [vmem:[#allocation57_spill] sm:$0xff] %v5129_v61  ;;  %1909 = vrot.lane.b32.xlu1 %v5003_v1, %s4384_s23  ;;  %1905 = vrot.lane.b32.xlu0 %v5005_v54, %s4384_s23  ;;  %v5154_v61 = vrot.slane %v955_v27, %v4723_v20 }
 0x151   : > { %v5149_v11 = vrot.slane %v923_v58, %v4723_v20  ;;  %v3731_v58 = vcombine.low %v4960_v36, %v4980_v10 }
 0x152   : > { %v5144_v63 = vpop.permute.xlu1 %1105  ;;  %v5146_v49 = vpop.permute.xlu0 %1107  ;;  %7139 = vst [vmem:[#allocation62_spill] sm:$0xff] %v5154_v61 }
 0x153   : > { %7136 = vst [vmem:[#allocation59_spill] sm:$0xff] %v5144_v63  ;;  %7137 = vst [vmem:[#allocation60_spill] sm:$0xff] %v5146_v49  ;;  %v3747_v49 = vcombine.low %v4970_v3, %v4982_v2  ;;  %v5181_v39 = vrot.slane %v3731_v58, %v4590_v22 }
 0x154   : > { %7138 = vst [vmem:[#allocation61_spill] sm:$0xff] %v5149_v11  ;;  %1883 = vrot.lane.b32.xlu1 %v5017_v45, %s4384_s23  ;;  %1913 = vrot.lane.b32.xlu0 %v5015_v14, %s4384_s23 }
 0x155   : > { %v5184_v63 = vrot.slane %v3747_v49, %v4590_v22 }
 0x156   : > { %v5158_v1 = vpop.permute.xlu1 %3517  ;;  %v5160_v54 = vpop.permute.xlu0 %3521 }
 0x157   : > { %v3795_v58 = vcombine.low %v5181_v39, %v5184_v63 }
 0x158   : > { %1891 = vrot.lane.b32.xlu1 %v5027_v60, %s4384_s23  ;;  %1887 = vrot.lane.b32.xlu0 %v5029_v59, %s4384_s23 }
 0x15a   : > { %v5172_v14 = vpop.permute.xlu1 %3525  ;;  %v5174_v45 = vpop.permute.xlu0 %3529 }
 0x15b   : > { %v3699_v27 = vcombine.low %v5158_v1, %v5172_v14  ;;  %v3715_v18 = vcombine.low %v5160_v54, %v5174_v45 }
 0x15c   : > { %1899 = vrot.lane.b32.xlu1 %v5037_v40, %s4384_s23  ;;  %1895 = vrot.lane.b32.xlu0 %v5041_v41, %s4384_s23  ;;  %v3595_v40 = vcombine.low %v4988_v28, %v4997_v53 }
 0x15d   : > { %v5189_v59 = vrot.slane %v3699_v27, %v4590_v22  ;;  %v5192_v60 = vrot.slane %v3715_v18, %v4590_v22  ;;  %v3611_v18 = vcombine.low %v4993_v34, %v4999_v52 }
 0x15e   : > { %v5196_v3 = vpop.permute.xlu1 %3515  ;;  %v5198_v2 = vpop.permute.xlu0 %3519  ;;  %v5224_v34 = vrot.slane %v3595_v40, %v4590_v22 }
 0x15f   : > { %7140 = vst [vmem:[#allocation63_spill] sm:$0xff] %v5196_v3  ;;  %7141 = vst [vmem:[#allocation64_spill] sm:$0xff] %v5198_v2  ;;  %v3763_v49 = vcombine.low %v5189_v59, %v5192_v60 }
 0x160   : > { %1907 = vrot.lane.b32.xlu1 %v5047_v56, %s4384_s23  ;;  %1903 = vrot.lane.b32.xlu0 %v5049_v43, %s4384_s23  ;;  %v5227_v56 = vrot.slane %v3611_v18, %v4590_v22  ;;  %v5232_v43 = vrot.slane %v3795_v58, %v4723_v20  ;;  %v3323_v58 = vcombine.low %v5009_v38, %v5025_v24 }
 0x161   : > { %v5217_v36 = vrot.slane %v3763_v49, %v4723_v20  ;;  %v740_v18 = vcombine.high %v5053_v13, %v5076_v50  ;;  %v756_v38 = vcombine.high %v4906_v23, %v4943_v32 }
 0x162   : > { %v5212_v41 = vpop.permute.xlu1 %3523  ;;  %v5214_v27 = vpop.permute.xlu0 %3527  ;;  %7144 = vst [vmem:[#allocation67_spill] sm:$0xff] %v5232_v43  ;;  %v5281_v24 = vrot.slane %v3323_v58, %v4590_v22 }
 0x163   : > { %7142 = vst [vmem:[#allocation65_spill] sm:$0xff] %v5214_v27  ;;  %7143 = vst [vmem:[#allocation66_spill] sm:$0xff] %v5217_v36  ;;  %v3563_v10 = vcombine.low %v5196_v3, %v5212_v41  ;;  %v3579_v28 = vcombine.low %v5198_v2, %v5214_v27  ;;  %v1078_v3 = vld [vmem:[#allocation2 + $0x80] sm:$0xff] }
 0x164   : > { %1109 = vrot.lane.b32.xlu1 %v4691_v4, %s4385_s28  ;;  %1911 = vrot.lane.b32.xlu0 %v5059_v16, %s4384_s23  ;;  %v1080_v16 = vld [vmem:[#allocation2 + $0x98] sm:$0xff]  ;;  %s4311_s23 = sshll.u32 %s4395_s13, 4  ;;  %s4312_s23 = int_to_ptr.vmem [resolvable:$false] %s4311_s23 }
 0x165   : > { %v5235_v49 = vrot.slane %v3563_v10, %v4590_v22  ;;  %v5238_v52 = vrot.slane %v3579_v28, %v4590_v22  ;;  %v3659_v10 = vcombine.low %v5224_v34, %v5227_v56  ;;  %v3307_v28 = vcombine.low %v5007_v37, %v5019_v7  ;;  %p4314_p9 = scmp.lt.s32.totalorder %s6926_s5, %s4312_s23 }
 0x166   : > { %v5242_v40 = vpop.permute.xlu1 %3093  ;;  %v5244_v53 = vpop.permute.xlu0 %3097 }
 0x167   : > { %7145 = vst [vmem:[#allocation68_spill] sm:$0xff] %v5242_v40  ;;  %7146 = vst [vmem:[#allocation69_spill] sm:$0xff] %v5244_v53  ;;  %v3627_v4 = vcombine.low %v5235_v49, %v5238_v52  ;;  %v5278_v13 = vrot.slane %v3307_v28, %v4590_v22  ;;  %v5287_v23 = vrot.slane %v3659_v10, %v4723_v20 }
 0x168   : > { %1117 = vrot.lane.b32.xlu1 %v4585_v15, %s4385_s28  ;;  %1113 = vrot.lane.b32.xlu0 %v4699_v6, %s4385_s28  ;;  %v772_v15 = vcombine.high %v4933_v57, %v4956_v29  ;;  %v754_v29 = vrot.slane %v740_v18, %v4590_v22  ;;  %v788_v28 = vcombine.high %v5093_v46, %v5096_v8 }
 0x169   : > { %v5267_v37 = vrot.slane %v3627_v4, %v4723_v20  ;;  %v724_v4 = vcombine.high %v5039_v35, %v5063_v62  ;;  %7150 = vst [vmem:[#allocation73_spill] sm:$0xff] %v5287_v23  ;;  %v1082_v35 = vld [vmem:[#allocation2 + $0xb0] sm:$0xff]  ;;  %v820_v18 = vcombine.high %v5079_v55, %v5082_v12  ;;  %v3371_v46 = vcombine.low %v5278_v13, %v5281_v24 }
 0x16a   : > { %v5262_v2 = vpop.permute.xlu1 %3101  ;;  %v5264_v27 = vpop.permute.xlu0 %3105 }
 0x16b   : > { %7147 = vst [vmem:[#allocation70_spill] sm:$0xff] %v5262_v2  ;;  %7148 = vst [vmem:[#allocation71_spill] sm:$0xff] %v5264_v27  ;;  %v3275_v6 = vcombine.low %v5242_v40, %v5262_v2  ;;  %v3291_v50 = vcombine.low %v5244_v53, %v5264_v27  ;;  %v738_v8 = vrot.slane %v724_v4, %v4590_v22 }
 0x16c   : > { %7149 = vst [vmem:[#allocation72_spill] sm:$0xff] %v5267_v37  ;;  %1125 = vrot.lane.b32.xlu1 %v1080_v16, %s4385_s28  ;;  %1121 = vrot.lane.b32.xlu0 %v1078_v3, %s4385_s28  ;;  %v770_v16 = vrot.slane %v756_v38, %v4590_v22  ;;  %v786_v3 = vrot.slane %v772_v15, %v4590_v22  ;;  %v1075_v15 = vld [vmem:[#allocation2 + $0x60] sm:$0xff] }
 0x16d   : > { %v5290_v57 = vrot.slane %v3275_v6, %v4590_v22  ;;  %v5293_v32 = vrot.slane %v3291_v50, %v4590_v22  ;;  %v1077_v50 = vld [vmem:[#allocation2 + $0x78] sm:$0xff]  ;;  %v803_v38 = vcombine.low %v738_v8, %v754_v29  ;;  %v802_v53 = vrot.slane %v788_v28, %v4723_v20 }
 0x16e   : > { %v5299_v58 = vpop.permute.xlu1 %3091  ;;  %v5301_v62 = vpop.permute.xlu0 %3095  ;;  %v835_v12 = vcombine.low %v770_v16, %v786_v3  ;;  %v834_v4 = vrot.slane %v820_v18, %v4723_v20  ;;  %v836_v18 = vcombine.high %v770_v16, %v786_v3  ;;  %v892_v16 = vcombine.high %v4887_v33, %v4941_v31 }
 0x16f   : > { %v3339_v6 = vcombine.low %v5290_v57, %v5293_v32  ;;  %v811_v28 = vrot.slane %v803_v38, %v4723_v20  ;;  %v860_v3 = vcombine.high %v5051_v0, %v5074_v9  ;;  %v956_v0 = vcombine.high %v5109_v25, %v5112_v17 }
 0x170   : > { %1111 = vrot.lane.b32.xlu1 %v4693_v5, %s4385_s28  ;;  %1129 = vrot.lane.b32.xlu0 %v1082_v35, %s4385_s28  ;;  %v5328_v5 = vrot.slane %v3371_v46, %v4723_v20  ;;  %v804_v35 = vcombine.high %v738_v8, %v754_v29  ;;  %v853_v2 = vcombine.low %v802_v53, %v834_v4 }
 0x171   : > { %v5323_v55 = vrot.slane %v3339_v6, %v4723_v20  ;;  %v843_v46 = vrot.slane %v835_v12, %v4723_v20  ;;  %v876_v29 = vcombine.high %v5061_v19, %v5100_v21  ;;  %v850_v21 = vrot.slane %v836_v18, %v4723_v20 }
 0x172   : > { %v5317_v10 = vpop.permute.xlu1 %3099  ;;  %v5319_v7 = vpop.permute.xlu0 %3103  ;;  %7152 = vst [vmem:[#allocation75_spill] sm:$0xff] %v5328_v5  ;;  %v818_v6 = vrot.slane %v804_v35, %v4723_v20  ;;  %v988_v35 = vcombine.high %v5149_v11, %v5154_v61  ;;  %v970_v25 = vrot.slane %v956_v0, %v4723_v20  ;;  %v7186_v61 = vld [vmem:[#allocation71_spill] sm:$0xff] }
 0x173   : > { %7151 = vst [vmem:[#allocation74_spill] sm:$0xff] %v5323_v55  ;;  %v855_v38 = vcombine.low %v811_v28, %v843_v46  ;;  %v890_v19 = vrot.slane %v876_v29, %v4590_v22 }
 0x174   : > { %1119 = vrot.lane.b32.xlu1 %v1077_v50, %s4385_s28  ;;  %1115 = vrot.lane.b32.xlu0 %v1075_v15, %s4385_s28  ;;  %v852_v50 = vcombine.high %v5119_v26, %v5132_v42  ;;  %v857_v31 = vcombine.low %v818_v6, %v850_v21  ;;  %v7188_v26 = vld [vmem:[#allocation52_spill] sm:$0xff] }
 0x176   : > { %v5331_v27 = vpop.permute.xlu1 %569  ;;  %v5333_v40 = vpop.permute.xlu0 %565 }
 0x177   : > { %7153 = vst [vmem:[#allocation76_spill] sm:$0xff] %v5331_v27  ;;  %7154 = vst [vmem:[#allocation77_spill] sm:$0xff] %v5333_v40  ;;  %v854_v27 = vcombine.high %v802_v53, %v834_v4  ;;  %v924_v53 = vcombine.high %v5122_v48, %v5125_v51  ;;  %v7189_v40 = vld [vmem:[#allocation50_spill] sm:$0xff] }
 0x178   : > { %1000 = vrot.lane.b32.xlu1 %v853_v2, %s4387_s7  ;;  %996 = vrot.lane.b32.xlu0 %v852_v50, %s4388_s16  ;;  %v908_v2 = vcombine.high %v4924_v44, %v4954_v30  ;;  %v856_v44 = vcombine.high %v811_v28, %v843_v46  ;;  %v906_v30 = vrot.slane %v892_v16, %v4590_v22 }
 0x179   : > { %v938_v28 = vrot.slane %v924_v53, %v4723_v20  ;;  %v858_v50 = vcombine.high %v818_v6, %v850_v21 }
 0x17a   : > { %v5345_v8 = vpop.permute.xlu1 %577  ;;  %v5347_v15 = vpop.permute.xlu0 %573  ;;  %v922_v9 = vrot.slane %v908_v2, %v4590_v22 }
 0x17b   : > { %7155 = vst [vmem:[#allocation78_spill] sm:$0xff] %v5345_v8  ;;  %7156 = vst [vmem:[#allocation79_spill] sm:$0xff] %v5347_v15  ;;  %v989_v2 = vcombine.low %v938_v28, %v970_v25 }
 0x17c   : > { %1008 = vrot.lane.b32.xlu1 %v855_v38, %s4389_s17  ;;  %1004 = vrot.lane.b32.xlu0 %v854_v27, %s4390_s26  ;;  %v874_v27 = vrot.slane %v860_v3, %v4590_v22  ;;  %v971_v18 = vcombine.low %v906_v30, %v922_v9  ;;  %v990_v38 = vcombine.high %v938_v28, %v970_v25  ;;  %v1079_v25 = vld [vmem:[#allocation2 + $0x90] sm:$0xff] }
 0x17d   : > { %v972_v3 = vcombine.high %v906_v30, %v922_v9  ;;  %v3764_v28 = vcombine.high %v5189_v59, %v5192_v60  ;;  %v3716_v59 = vcombine.high %v5160_v54, %v5174_v45  ;;  %v3628_v54 = vcombine.high %v5235_v49, %v5238_v52 }
 0x17e   : > { %v5362_v12 = vpop.permute.xlu1 %585  ;;  %v5364_v33 = vpop.permute.xlu0 %581  ;;  %v939_v51 = vcombine.low %v874_v27, %v890_v19  ;;  %v940_v17 = vcombine.high %v874_v27, %v890_v19  ;;  %v979_v6 = vrot.slane %v971_v18, %v4723_v20 }
 0x17f   : > { %7157 = vst [vmem:[#allocation80_spill] sm:$0xff] %v5362_v12  ;;  %7158 = vst [vmem:[#allocation81_spill] sm:$0xff] %v5364_v33  ;;  %v986_v0 = vrot.slane %v972_v3, %v4723_v20 }
 0x180   : > { %1016 = vrot.lane.b32.xlu1 %v857_v31, %s4391_s29  ;;  %1012 = vrot.lane.b32.xlu0 %v856_v44, %s4392_s30  ;;  %v947_v16 = vrot.slane %v939_v51, %v4723_v20  ;;  %v954_v31 = vrot.slane %v940_v17, %v4723_v20  ;;  %v3139_v17 = vcombine.low %v5299_v58, %v5317_v10 }
 0x182   : > { %v5373_v48 = vpop.permute.xlu1 %593  ;;  %v5375_v4 = vpop.permute.xlu0 %589  ;;  %v992_v19 = vcombine.high %v947_v16, %v979_v6  ;;  %v991_v44 = vcombine.low %v947_v16, %v979_v6  ;;  %v994_v27 = vcombine.high %v954_v31, %v986_v0  ;;  %v993_v51 = vcombine.low %v954_v31, %v986_v0  ;;  %v7167_v31 = vld [vmem:[#allocation44_spill] sm:$0xff] }
 0x183   : > { %7159 = vst [vmem:[#allocation82_spill] sm:$0xff] %v5373_v48  ;;  %7160 = vst [vmem:[#allocation83_spill] sm:$0xff] %v5375_v4  ;;  %v3796_v16 = vcombine.high %v5181_v39, %v5184_v63  ;;  %v3692_v39 = vcombine.high %v5267_v37, %v5287_v23  ;;  %v3828_v63 = vcombine.high %v5217_v36, %v5232_v43  ;;  %v7190_v37 = vld [vmem:[#allocation53_spill] sm:$0xff]  ;;  %v7191_v43 = vld [vmem:[#allocation51_spill] sm:$0xff] }
 0x184   : > { %1024 = vrot.lane.b32.xlu1 %v988_v35, %s4388_s16  ;;  %1020 = vrot.lane.b32.xlu0 %v858_v50, %s4393_s27  ;;  %v1081_v35 = vld [vmem:[#allocation2 + $0xa8] sm:$0xff]  ;;  %v3308_v23 = vcombine.high %v7189_v40, %v7188_v26  ;;  %v3324_v36 = vcombine.high %v7191_v43, %v7190_v37  ;;  %v7195_v26 = vld [vmem:[#allocation26_spill] sm:$0xff] }
 0x185   : > { %v3810_v52 = vrot.slane %v3796_v16, %v4723_v20  ;;  %v3404_v16 = vcombine.high %v5323_v55, %v5328_v5  ;;  %v7197_v37 = vld [vmem:[#allocation18_spill] sm:$0xff] }
 0x186   : > { %v5383_v46 = vpop.permute.xlu1 %601  ;;  %v5385_v29 = vpop.permute.xlu0 %597  ;;  %v4224_v55 = vld [vmem:[#allocation2 + $0x86] ss:$48 sps:$4 sm:$0xff]  }
 0x187   : > { %7161 = vst [vmem:[#allocation84_spill] sm:$0xff] %v5383_v46  ;;  %7162 = vst [vmem:[#allocation85_spill] sm:$0xff] %v5385_v29  ;;  %v7183_v46 = vld [vmem:[#allocation34_spill] sm:$0xff] }
 0x188   : > { %1032 = vrot.lane.b32.xlu1 %v990_v38, %s4390_s26  ;;  %1028 = vrot.lane.b32.xlu0 %v989_v2, %s4387_s7  ;;  %v3155_v38 = vcombine.low %v5301_v62, %v5319_v7  ;;  %v3700_v2 = vcombine.high %v5158_v1, %v5172_v14  ;;  %v3778_v1 = vrot.slane %v3764_v28, %v4723_v20  ;;  %v7184_v29 = vld [vmem:[#allocation70_spill] sm:$0xff] }
 0x189   : > { %v5437_v14 = vrot.slane %v3139_v17, %v4590_v22  ;;  %v3660_v28 = vcombine.high %v5224_v34, %v5227_v56 }
 0x18a   : > { %v5391_v21 = vpop.permute.xlu1 %609  ;;  %v5393_v53 = vpop.permute.xlu0 %605  ;;  %v5440_v45 = vrot.slane %v3155_v38, %v4590_v22  ;;  %v5453_v49 = vrot.slane %v3700_v2, %v4590_v22 }
 0x18b   : > { %7163 = vst [vmem:[#allocation86_spill] sm:$0xff] %v5391_v21  ;;  %7164 = vst [vmem:[#allocation87_spill] sm:$0xff] %v5393_v53 }
 0x18c   : > { %1040 = vrot.lane.b32.xlu1 %v992_v19, %s4392_s30  ;;  %1036 = vrot.lane.b32.xlu0 %v991_v44, %s4389_s17  ;;  %v7168_v44 = vld [vmem:[#allocation42_spill] sm:$0xff]  ;;  %v3203_v2 = vcombine.low %v5437_v14, %v5440_v45 }
 0x18d   : > { %v3732_v0 = vcombine.high %v7168_v44, %v7167_v31  ;;  %v3340_v31 = vcombine.high %v5290_v57, %v5293_v32  ;;  %v3372_v57 = vcombine.high %v5278_v13, %v5281_v24  ;;  %v3674_v44 = vrot.slane %v3660_v28, %v4723_v20 }
 0x18e   : > { %v5399_v30 = vpop.permute.xlu1 %617  ;;  %v5401_v9 = vpop.permute.xlu0 %613  ;;  %v3830_v13 = vcombine.high %v3778_v1, %v3810_v52  ;;  %v5500_v28 = vrot.slane %v3203_v2, %v4723_v20 }
 0x18f   : > { %7165 = vst [vmem:[#allocation88_spill] sm:$0xff] %v5399_v30  ;;  %7166 = vst [vmem:[#allocation89_spill] sm:$0xff] %v5401_v9  ;;  %v7176_v30 = vld [vmem:[#allocation48_spill] sm:$0xff]  ;;  %v7178_v9 = vld [vmem:[#allocation49_spill] sm:$0xff] }
 0x190   : > { %1048 = vrot.lane.b32.xlu1 %v994_v27, %s4393_s27  ;;  %1044 = vrot.lane.b32.xlu0 %v993_v51, %s4391_s29  ;;  %v7169_v27 = vld [vmem:[#allocation45_spill] sm:$0xff]  ;;  %v7170_v51 = vld [vmem:[#allocation43_spill] sm:$0xff]  ;;  %7175 = vst [vmem:[#allocation42_spill] sm:$0xff] %v5500_v28 }
 0x192   : > { %v5407_v50 = vpop.permute.xlu1 %3115  ;;  %v5409_v18 = vpop.permute.xlu0 %3111 }
 0x193   : > { %v3171_v60 = vcombine.low %v5035_v47, %v5407_v50 }
 0x194   : > { %1127 = vrot.lane.b32.xlu1 %v1081_v35, %s4385_s28  ;;  %1123 = vrot.lane.b32.xlu0 %v1079_v25, %s4385_s28  ;;  %v3748_v35 = vcombine.high %v7170_v51, %v7169_v27  ;;  %v5456_v25 = vrot.slane %v3716_v59, %v4590_v22  ;;  %v7173_v51 = vld [vmem:[#allocation65_spill] sm:$0xff]  ;;  %s4313_s28 = scalar_lea.vmem %s4312_s23, 512 }
 0x195   : > { %v3179_v17 = vrot.slane %v3171_v60, %v4590_v22  ;;  %v3642_v60 = vrot.slane %v3628_v54, %v4723_v20  ;;  %p4315_p10 = scmp.lt.s32.totalorder %s4313_s28, %s4307_s20 }
 0x196   : > { %v5425_v3 = vpop.permute.xlu1 %2309  ;;  %v5427_v6 = vpop.permute.xlu0 %3119  ;;  %v3779_v32 = vcombine.low %v5453_v49, %v5456_v25 }
 0x197   : > { %v3187_v19 = vcombine.low %v5409_v18, %v5427_v6  ;;  %v3694_v21 = vcombine.high %v3642_v60, %v3674_v44  ;;  %p4316_p2 = por %p4315_p10, %p4314_p9 }
 0x198   : > { %3836 = vrot.lane.b32.xlu1 %v3692_v39, %s4388_s16  ;;  %3864 = vrot.lane.b32.xlu0 %v3828_v63, %s4388_s16  ;;  %v3829_v39 = vcombine.low %v3778_v1, %v3810_v52  ;;  %v5476_v63 = vrot.slane %v3748_v35, %v4590_v22  ;;  %v7174_v35 = vld [vmem:[#allocation64_spill] sm:$0xff]  ;;  %v3386_v1 = vrot.slane %v3372_v57, %v4723_v20 }
 0x199   : > { %v3195_v38 = vrot.slane %v3187_v19, %v4590_v22  ;;  %v5473_v19 = vrot.slane %v3732_v0, %v4590_v22  ;;  %v7172_v0 = vld [vmem:[#allocation63_spill] sm:$0xff]  ;;  %v3580_v4 = vcombine.high %v7174_v35, %v7173_v51  ;;  %v5512_v52 = vrot.slane %v3779_v32, %v4723_v20  ;;  %p4317_p0 = pnand %p4316_p2, %p4310_p8 }
 0x19a   : > { %v5463_v34 = vpop.permute.xlu1 %2317  ;;  %v5465_v56 = vpop.permute.xlu0 %2313  ;;  %v3564_v27 = vcombine.high %v7172_v0, %v5212_v41  ;;  %v7177_v41 = vld [vmem:[#allocation46_spill] sm:$0xff]  ;;  %v7179_v51 = vld [vmem:[#allocation47_spill] sm:$0xff] }
 0x19b   : > { %v3235_v59 = vcombine.low %v3179_v17, %v3195_v38  ;;  %v3596_v0 = vcombine.high %v7177_v41, %v7176_v30  ;;  %v3612_v35 = vcombine.high %v7179_v51, %v7178_v9  ;;  %v5520_v30 = vrot.slane %v3580_v4, %v4590_v22 }
 0x19c   : > { %3440 = vrot.lane.b32.xlu1 %v3404_v16, %s4388_s16  ;;  %3868 = vrot.lane.b32.xlu0 %v3829_v39, %s4387_s7  ;;  %v5497_v16 = vrot.slane %v3340_v31, %v4723_v20  ;;  %v3693_v39 = vcombine.low %v3642_v60, %v3674_v44  ;;  %v5517_v2 = vrot.slane %v3564_v27, %v4590_v22 }
 0x19d   : > { %v5486_v54 = vrot.slane %v3235_v59, %v4723_v20  ;;  %v3811_v59 = vcombine.low %v5473_v19, %v5476_v63  ;;  %v3236_v41 = vcombine.high %v3179_v17, %v3195_v38  ;;  %v5532_v51 = vrot.slane %v3596_v0, %v4590_v22 }
 0x19e   : > { %v5492_v12 = vpop.permute.xlu1 %2325  ;;  %v5494_v24 = vpop.permute.xlu0 %2321  ;;  %v3405_v57 = vcombine.low %v5497_v16, %v3386_v1  ;;  %v5535_v27 = vrot.slane %v3612_v35, %v4590_v22  ;;  %v3204_v4 = vcombine.high %v5437_v14, %v5440_v45  ;;  %v2491_v38 = vcombine.low %v5425_v3, %v5463_v34 }
 0x19f   : > { %7171 = vst [vmem:[#allocation44_spill] sm:$0xff] %v5486_v54  ;;  %v2507_v32 = vcombine.low %v5465_v56, %v5494_v24  ;;  %v3819_v17 = vrot.slane %v3811_v59, %v4723_v20  ;;  %v3643_v0 = vcombine.low %v5517_v2, %v5520_v30  ;;  %v5554_v45 = vrot.slane %v3236_v41, %v4723_v20 }
 0x1a0   : > { %3872 = vrot.lane.b32.xlu1 %v3830_v13, %s4390_s26  ;;  %3840 = vrot.lane.b32.xlu0 %v3693_v39, %s4387_s7  ;;  %v3268_v39 = vcombine.high %v5500_v28, %v5486_v54  ;;  %v3218_v8 = vrot.slane %v3204_v4, %v4723_v20  ;;  %v5566_v53 = vrot.slane %v2491_v38, %v4590_v22 }
 0x1a1   : > { %v3831_v14 = vcombine.low %v5512_v52, %v3819_v17  ;;  %v5557_v59 = vrot.slane %v2507_v32, %v4590_v22  ;;  %v5583_v38 = vrot.slane %v3643_v0, %v4723_v20  ;;  %v5623_v54 = vrot.slane %v3308_v23, %v4590_v22 }
 0x1a2   : > { %v5522_v9 = vpop.permute.xlu1 %2333  ;;  %v5524_v13 = vpop.permute.xlu0 %2329  ;;  %v3269_v44 = vcombine.low %v3218_v8, %v5554_v45  ;;  %v5626_v28 = vrot.slane %v3324_v36, %v4590_v22  ;;  %v3812_v5 = vcombine.high %v5473_v19, %v5476_v63 }
 0x1a3   : > { %v2523_v31 = vcombine.low %v5492_v12, %v5522_v9 }
 0x1a4   : > { %3444 = vrot.lane.b32.xlu1 %v3405_v57, %s4387_s7  ;;  %3412 = vrot.lane.b32.xlu0 %v3268_v39, %s4388_s16  ;;  %v3675_v39 = vcombine.low %v5532_v51, %v5535_v27 }
 0x1a5   : > { %v5569_v41 = vrot.slane %v2523_v31, %v4590_v22  ;;  %v7185_v31 = vld [vmem:[#allocation68_spill] sm:$0xff] }
 0x1a6   : > { %v5548_v35 = vpop.permute.xlu1 %2307  ;;  %v5550_v33 = vpop.permute.xlu0 %2337  ;;  %v3276_v48 = vcombine.high %v7185_v31, %v7184_v29  ;;  %v3683_v0 = vrot.slane %v3675_v39, %v4723_v20 }
 0x1a7   : > { %7180 = vst [vmem:[#allocation45_spill] sm:$0xff] %v5548_v35  ;;  %v2539_v57 = vcombine.low %v5524_v13, %v5550_v33 }
 0x1a8   : > { %3876 = vrot.lane.b32.xlu1 %v3831_v14, %s4389_s17  ;;  %3844 = vrot.lane.b32.xlu0 %v3694_v21, %s4390_s26  ;;  %v7182_v14 = vld [vmem:[#allocation32_spill] sm:$0xff]  ;;  %v2555_v21 = vcombine.low %v5566_v53, %v5557_v59 }
 0x1a9   : > { %v5572_v32 = vrot.slane %v2539_v57, %v4590_v22  ;;  %v2980_v4 = vcombine.high %v7183_v46, %v7182_v14  ;;  %v7187_v57 = vld [vmem:[#allocation69_spill] sm:$0xff]  ;;  %v7194_v14 = vld [vmem:[#allocation22_spill] sm:$0xff]  ;;  %v7196_v46 = vld [vmem:[#allocation19_spill] sm:$0xff] }
 0x1aa   : > { %v5575_v15 = vpop.permute.xlu1 %2315  ;;  %v5577_v60 = vpop.permute.xlu0 %2311  ;;  %v3292_v11 = vcombine.high %v7187_v57, %v7186_v61  ;;  %v3695_v57 = vcombine.low %v5583_v38, %v3683_v0  ;;  %v2916_v40 = vcombine.high %v7195_v26, %v7194_v14  ;;  %v2948_v43 = vcombine.high %v7197_v37, %v7196_v46 }
 0x1ab   : > { %7181 = vst [vmem:[#allocation43_spill] sm:$0xff] %v5575_v15  ;;  %v2587_v42 = vcombine.low %v5569_v41, %v5572_v32  ;;  %v3387_v26 = vcombine.low %v5623_v54, %v5626_v28 }
 0x1ac   : > { %3416 = vrot.lane.b32.xlu1 %v3269_v44, %s4387_s7  ;;  %3016 = vrot.lane.b32.xlu0 %v2980_v4, %s4388_s16  ;;  %v5613_v44 = vrot.slane %v3276_v48, %v4590_v22  ;;  %v5616_v39 = vrot.slane %v3292_v11, %v4590_v22  ;;  %v5620_v4 = vrot.slane %v2555_v21, %v4723_v20 }
 0x1ad   : > { %v5601_v61 = vrot.slane %v2587_v42, %v4723_v20  ;;  %v3406_v42 = vcombine.high %v5497_v16, %v3386_v1  ;;  %v7199_v16 = vld [vmem:[#allocation33_spill] sm:$0xff]  ;;  %v7200_v1 = vld [vmem:[#allocation35_spill] sm:$0xff]  ;;  %v5639_v23 = vrot.slane %v2916_v40, %v4723_v20  ;;  %v5642_v36 = vrot.slane %v2948_v43, %v4723_v20 }
 0x1ae   : > { %v5603_v29 = vpop.permute.xlu1 %2323  ;;  %v5605_v31 = vpop.permute.xlu0 %2319  ;;  %7198 = vst [vmem:[#allocation64_spill] sm:$0xff] %v5620_v4  ;;  %v2844_v14 = vcombine.high %v7200_v1, %v7199_v16  ;;  %v3355_v21 = vcombine.low %v5613_v44, %v5616_v39  ;;  %v2355_v43 = vcombine.low %v5548_v35, %v5575_v15  ;;  %v3188_v16 = vcombine.high %v5409_v18, %v5427_v6 }
 0x1af   : > { %7192 = vst [vmem:[#allocation63_spill] sm:$0xff] %v5601_v61  ;;  %7193 = vst [vmem:[#allocation65_spill] sm:$0xff] %v5603_v29  ;;  %v2371_v37 = vcombine.low %v5577_v60, %v5605_v31  ;;  %v3156_v18 = vcombine.high %v5301_v62, %v5319_v7  ;;  %v3172_v6 = vcombine.high %v5035_v47, %v5407_v50  ;;  %v7204_v62 = vld [vmem:[#allocation23_spill] sm:$0xff]  ;;  %v7206_v50 = vld [vmem:[#allocation21_spill] sm:$0xff] }
 0x1b0   : > { %3848 = vrot.lane.b32.xlu1 %v3695_v57, %s4389_s17  ;;  %3448 = vrot.lane.b32.xlu0 %v3406_v42, %s4390_s26  ;;  %v3832_v57 = vcombine.high %v5512_v52, %v3819_v17  ;;  %v3270_v52 = vcombine.high %v3218_v8, %v5554_v45  ;;  %v2981_v17 = vcombine.low %v5639_v23, %v5642_v36 }
 0x1b1   : > { %v5671_v1 = vrot.slane %v3355_v21, %v4723_v20  ;;  %v3140_v8 = vcombine.high %v5299_v58, %v5317_v10  ;;  %v5678_v45 = vrot.slane %v2371_v37, %v4590_v22  ;;  %v5696_v58 = vrot.slane %v2355_v43, %v4590_v22  ;;  %v7205_v21 = vld [vmem:[#allocation27_spill] sm:$0xff] }
 0x1b2   : > { %v5632_v11 = vpop.permute.xlu1 %2331  ;;  %v5634_v46 = vpop.permute.xlu0 %2327  ;;  %v3696_v7 = vcombine.high %v5583_v38, %v3683_v0  ;;  %v2780_v47 = vcombine.high %v7205_v21, %v7204_v62  ;;  %v5731_v62 = vrot.slane %v3812_v5, %v4723_v20 }
 0x1b3   : > { %v2387_v40 = vcombine.low %v5603_v29, %v5632_v11  ;;  %v2419_v38 = vcombine.low %v5696_v58, %v5678_v45  ;;  %v5721_v0 = vrot.slane %v3140_v8, %v4590_v22 }
 0x1b4   : > { %2988 = vrot.lane.b32.xlu1 %v2844_v14, %s4388_s16  ;;  %3880 = vrot.lane.b32.xlu0 %v3832_v57, %s4392_s30  ;;  %v3780_v14 = vcombine.high %v5453_v49, %v5456_v25  ;;  %v5682_v49 = vrot.slane %v3387_v26, %v4723_v20  ;;  %v7207_v26 = vld [vmem:[#allocation20_spill] sm:$0xff]  ;;  %v5748_v5 = vrot.slane %v2780_v47, %v4723_v20 }
 0x1b5   : > { %v5689_v25 = vrot.slane %v2387_v40, %v4590_v22  ;;  %v2812_v37 = vcombine.high %v7207_v26, %v7206_v50  ;;  %v5708_v40 = vrot.slane %v3188_v16, %v4590_v22  ;;  %v5724_v16 = vrot.slane %v3156_v18, %v4590_v22  ;;  %v7211_v18 = vld [vmem:[#allocation13_spill] sm:$0xff] }
 0x1b6   : > { %v5657_v42 = vpop.permute.xlu1 %1885  ;;  %v5659_v48 = vpop.permute.xlu0 %2335  ;;  %v3407_v43 = vcombine.low %v5671_v1, %v5682_v49  ;;  %vm3909_vm8 = vcmp.eq.s32.totalorder %v7211_v18, 0  ;;  %v4223_v18 = vld [vmem:[#allocation2 + $0x6e] ss:$48 sps:$4 sm:$0xff]  }
 0x1b7   : > { %7201 = vst [vmem:[#allocation48_spill] sm:$0xff] %v5657_v42  ;;  %v2403_v57 = vcombine.low %v5634_v46, %v5659_v48  ;;  %v5751_v26 = vrot.slane %v2812_v37, %v4723_v20  ;;  %v2982_v37 = vcombine.high %v5639_v23, %v5642_v36  ;;  %v5779_v23 = vrot.slane %v4223_v18, %v4590_v22 }
 0x1b8   : > { %3420 = vrot.lane.b32.xlu1 %v3270_v52, %s4390_s26  ;;  %3020 = vrot.lane.b32.xlu0 %v2981_v17, %s4387_s7  ;;  %v5715_v17 = vrot.slane %v3780_v14, %v4723_v20 }
 0x1b9   : > { %v5692_v19 = vrot.slane %v2403_v57, %v4590_v22  ;;  %v5727_v57 = vrot.slane %v3172_v6, %v4590_v22  ;;  %v2845_v15 = vcombine.low %v5748_v5, %v5751_v26 }
 0x1ba   : > { %v5698_v10 = vpop.permute.xlu1 %1893  ;;  %v5700_v63 = vpop.permute.xlu0 %1889  ;;  %v3833_v50 = vcombine.low %v5715_v17, %v5731_v62 }
 0x1bb   : > { %7202 = vst [vmem:[#allocation46_spill] sm:$0xff] %v5698_v10  ;;  %7203 = vst [vmem:[#allocation49_spill] sm:$0xff] %v5700_v63  ;;  %v2451_v52 = vcombine.low %v5689_v25, %v5692_v19  ;;  %v3251_v6 = vcombine.low %v5727_v57, %v5708_v40  ;;  %v2067_v18 = vcombine.low %v5657_v42, %v5698_v10 }
 0x1bc   : > { %3852 = vrot.lane.b32.xlu1 %v3696_v7, %s4392_s30  ;;  %3452 = vrot.lane.b32.xlu0 %v3407_v43, %s4389_s17  ;;  %v2620_v7 = vcombine.high %v5620_v4, %v5601_v61  ;;  %v4394_v43 = vmov 1.0   ;;  %v3219_v61 = vcombine.low %v5721_v0, %v5724_v16  ;;  %v4222_v4 = vld [vmem:[#allocation2 + $0x26] ss:$48 sps:$4 sm:$0xff]   ;;  %v3356_v42 = vcombine.high %v5613_v44, %v5616_v39 }
 0x1bd   : > { %v5740_v8 = vrot.slane %v2451_v52, %v4723_v20  ;;  %4124 = vmatprep.subr.msk.mxu0 %vm3909_vm8, %v4394_v43  ;;  %v5755_v52 = vrot.slane %v2419_v38, %v4723_v20  ;;  %v3644_v38 = vcombine.high %v5517_v2, %v5520_v30  ;;  %v3676_v2 = vcombine.high %v5532_v51, %v5535_v27 }
 0x1be   : > { %v5733_v14 = vpop.permute.xlu1 %1901  ;;  %v5735_v21 = vpop.permute.xlu0 %1897  ;;  %4125 = vmatpush1.msk.msra.mxu0 %vm3909_vm8, %v4394_v43  ;;  %v4221_v43 = vld [vmem:[#allocation2 + $0xe] ss:$48 sps:$4 sm:$0xff]   ;;  %v5785_v30 = vrot.slane %v3219_v61, %v4723_v20  ;;  %v5788_v36 = vrot.slane %v4222_v4, %v4590_v22 }
 0x1bf   : > { %7208 = vst [vmem:[#allocation47_spill] sm:$0xff] %v5733_v14  ;;  %7209 = vst [vmem:[#allocation70_spill] sm:$0xff] %v5735_v21  ;;  %v2083_v29 = vcombine.low %v5700_v63, %v5735_v21  ;;  %v5808_v4 = vrot.slane %v3644_v38, %v4723_v20  ;;  %v3834_v38 = vcombine.high %v5715_v17, %v5731_v62  ;;  %v4226_v63 = vld [vmem:[#allocation2 + $0x1e] ss:$48 sps:$4 sm:$0xff]  }
 0x1c0   : > { %7210 = vst [vmem:[#allocation68_spill] sm:$0xff] %v5740_v8  ;;  %2656 = vrot.lane.b32.xlu1 %v2620_v7, %s4388_s16  ;;  %7212 = vst [vmem:[#allocation71_spill] sm:$0xff] %v5755_v52  ;;  %3884 = vrot.lane.b32.xlu0 %v3833_v50, %s4391_s29  ;;  %v5773_v50 = vrot.slane %v3251_v6, %v4723_v20  ;;  %v5791_v6 = vrot.slane %v4224_v55, %v4590_v22 }
 0x1c1   : > { %v5816_v7 = vrot.slane %v2083_v29, %v4590_v22 }
 0x1c2   : > { %v5760_v47 = vpop.permute.xlu1 %1909  ;;  %v5768_v35 = vpop.permute.xlu0 %1905  ;;  %v3271_v55 = vcombine.low %v5785_v30, %v5773_v50 }
 0x1c3   : > { %7213 = vst [vmem:[#allocation69_spill] sm:$0xff] %v5760_v47  ;;  %7214 = vst [vmem:[#allocation52_spill] sm:$0xff] %v5768_v35  ;;  %v2099_v51 = vcombine.low %v5733_v14, %v5760_v47 }
 0x1c4   : > { %3024 = vrot.lane.b32.xlu1 %v2982_v37, %s4390_s26  ;;  %2992 = vrot.lane.b32.xlu0 %v2845_v15, %s4387_s7  ;;  %v2588_v37 = vcombine.high %v5569_v41, %v5572_v32  ;;  %v3408_v15 = vcombine.high %v5671_v1, %v5682_v49  ;;  %v5811_v41 = vrot.slane %v4221_v43, %v4590_v22 }
 0x1c5   : > { %v2556_v32 = vcombine.high %v5566_v53, %v5557_v59  ;;  %v5823_v49 = vrot.slane %v3676_v2, %v4723_v20  ;;  %v2963_v53 = vcombine.low %v5779_v23, %v5791_v6  ;;  %v5832_v59 = vrot.slane %v2067_v18, %v4590_v22 }
 0x1c6   : > { %v5799_v27 = vpop.permute.xlu1 %1883  ;;  %v5803_v61 = vpop.permute.xlu0 %1913  ;;  %v2931_v43 = vcombine.low %v5811_v41, %v5788_v36  ;;  %v5835_v29 = vrot.slane %v2099_v51, %v4590_v22 }
 0x1c7   : > { %7215 = vst [vmem:[#allocation50_spill] sm:$0xff] %v5799_v27  ;;  %v2115_v1 = vcombine.low %v5768_v35, %v5803_v61  ;;  %v3697_v62 = vcombine.low %v5808_v4, %v5823_v49  ;;  %v2131_v18 = vcombine.low %v5832_v59, %v5816_v7 }
 0x1c8   : > { %3456 = vrot.lane.b32.xlu1 %v3408_v15, %s4392_s30  ;;  %3424 = vrot.lane.b32.xlu0 %v3271_v55, %s4389_s17  ;;  %v5843_v55 = vrot.slane %v2588_v37, %v4723_v20  ;;  %v5859_v37 = vrot.slane %v2963_v53, %v4723_v20  ;;  %v5868_v47 = vrot.slane %v2931_v43, %v4723_v20 }
 0x1c9   : > { %v5838_v15 = vrot.slane %v2115_v1, %v4590_v22  ;;  %v5855_v1 = vrot.slane %v2556_v32, %v4723_v20  ;;  %v2484_v53 = vcombine.high %v5755_v52, %v5740_v8  ;;  %v5881_v44 = vrot.slane %v2131_v18, %v4723_v20  ;;  %v4227_v8 = vld [vmem:[#allocation2 + $0x66] ss:$48 sps:$4 sm:$0xff]   ;;  %v4228_v52 = vld [vmem:[#allocation2 + $0x7e] ss:$48 sps:$4 sm:$0xff]  }
 0x1ca   : > { %v5840_v2 = vpop.permute.xlu1 %1891  ;;  %v5845_v17 = vpop.permute.xlu0 %1887  ;;  %v2983_v43 = vcombine.low %v5868_v47, %v5859_v37  ;;  %v5910_v35 = vrot.slane %v4227_v8, %v4590_v22 }
 0x1cb   : > { %v2163_v51 = vcombine.low %v5835_v29, %v5838_v15  ;;  %v2621_v14 = vcombine.low %v5855_v1, %v5843_v55  ;;  %7218 = vst [vmem:[#allocation22_spill] sm:$0xff] %v5881_v44 }
 0x1cc   : > { %3888 = vrot.lane.b32.xlu1 %v3834_v38, %s4393_s27  ;;  %3856 = vrot.lane.b32.xlu0 %v3697_v62, %s4391_s29  ;;  %v3388_v62 = vcombine.high %v5623_v54, %v5626_v28  ;;  %v5907_v54 = vrot.slane %v4226_v63, %v4590_v22  ;;  %v3272_v63 = vcombine.high %v5785_v30, %v5773_v50 }
 0x1cd   : > { %v5871_v38 = vrot.slane %v2163_v51, %v4723_v20  ;;  %v5889_v51 = vrot.slane %v3356_v42, %v4723_v20 }
 0x1ce   : > { %v5863_v10 = vpop.permute.xlu1 %1899  ;;  %v5873_v32 = vpop.permute.xlu0 %1895  ;;  %v5899_v18 = vrot.slane %v3388_v62, %v4723_v20 }
 0x1cf   : > { %7216 = vst [vmem:[#allocation53_spill] sm:$0xff] %v5863_v10  ;;  %7217 = vst [vmem:[#allocation51_spill] sm:$0xff] %v5871_v38  ;;  %v1947_v62 = vcombine.low %v5845_v17, %v5873_v32  ;;  %v2196_v30 = vcombine.high %v5881_v44, %v5871_v38  ;;  %v2540_v38 = vcombine.high %v5524_v13, %v5550_v33 }
 0x1d0   : > { %2660 = vrot.lane.b32.xlu1 %v2621_v14, %s4387_s7  ;;  %2628 = vrot.lane.b32.xlu0 %v2484_v53, %s4388_s16  ;;  %v2846_v14 = vcombine.high %v5748_v5, %v5751_v26  ;;  %v4225_v53 = vld [vmem:[#allocation2 + $0x6] ss:$48 sps:$4 sm:$0xff]   ;;  %v3409_v21 = vcombine.low %v5889_v51, %v5899_v18  ;;  %v5913_v5 = vrot.slane %v4228_v52, %v4590_v22 }
 0x1d1   : > { %v2452_v26 = vcombine.high %v5689_v25, %v5692_v19  ;;  %v5929_v52 = vrot.slane %v4225_v53, %v4590_v22  ;;  %v2420_v25 = vcombine.high %v5696_v58, %v5678_v45  ;;  %v1931_v19 = vcombine.low %v5799_v27, %v5840_v2 }
 0x1d2   : > { %v5884_v39 = vpop.permute.xlu1 %1907  ;;  %v5893_v28 = vpop.permute.xlu0 %1903  ;;  %v2827_v53 = vcombine.low %v5910_v35, %v5913_v5  ;;  %v5948_v45 = vrot.slane %v1947_v62, %v4590_v22  ;;  %v3252_v13 = vcombine.high %v5727_v57, %v5708_v40  ;;  %v2984_v40 = vcombine.high %v5868_v47, %v5859_v37 }
 0x1d3   : > { %v5958_v27 = vrot.slane %v2452_v26, %v4723_v20  ;;  %v5964_v44 = vrot.slane %v1931_v19, %v4590_v22  ;;  %v2524_v19 = vcombine.high %v5492_v12, %v5522_v9  ;;  %v3220_v12 = vcombine.high %v5721_v0, %v5724_v16 }
 0x1d4   : > { %3028 = vrot.lane.b32.xlu1 %v2983_v43, %s4389_s17  ;;  %2996 = vrot.lane.b32.xlu0 %v2846_v14, %s4390_s26  ;;  %v1963_v43 = vcombine.low %v5863_v10, %v5884_v39  ;;  %v5980_v33 = vrot.slane %v2827_v53, %v4723_v20  ;;  %v2492_v9 = vcombine.high %v5425_v3, %v5463_v34 }
 0x1d5   : > { %v6004_v57 = vrot.slane %v2540_v38, %v4590_v22  ;;  %v6021_v34 = vrot.slane %v2524_v19, %v4590_v22  ;;  %v6026_v38 = vrot.slane %v3252_v13, %v4723_v20 }
 0x1d6   : > { %v5902_v42 = vpop.permute.xlu1 %1109  ;;  %v5921_v14 = vpop.permute.xlu0 %1911  ;;  %v5951_v58 = vrot.slane %v1963_v43, %v4590_v22  ;;  %v5970_v43 = vrot.slane %v2420_v25, %v4723_v20  ;;  %v1995_v25 = vcombine.low %v5964_v44, %v5948_v45  ;;  %v6045_v13 = vrot.slane %v2492_v9, %v4590_v22 }
 0x1d7   : > { %7219 = vst [vmem:[#allocation26_spill] sm:$0xff] %v5902_v42  ;;  %v1979_v8 = vcombine.low %v5893_v28, %v5921_v14 }
 0x1d8   : > { %3460 = vrot.lane.b32.xlu1 %v3409_v21, %s4391_s29  ;;  %3428 = vrot.lane.b32.xlu0 %v3272_v63, %s4392_s30  ;;  %v2795_v21 = vcombine.low %v5929_v52, %v5907_v54 }
 0x1d9   : > { %v5937_v10 = vrot.slane %v1979_v8, %v4590_v22  ;;  %v3698_v8 = vcombine.high %v5808_v4, %v5823_v49  ;;  %v2622_v49 = vcombine.high %v5855_v1, %v5843_v55  ;;  %v2485_v55 = vcombine.low %v5970_v43, %v5958_v27 }
 0x1da   : > { %v5939_v50 = vpop.permute.xlu1 %1117  ;;  %v5953_v63 = vpop.permute.xlu0 %1113  ;;  %v5977_v26 = vrot.slane %v2795_v21, %v4723_v20  ;;  %v2508_v1 = vcombine.high %v5465_v56, %v5494_v24  ;;  %v7222_v21 = vld [vmem:[#allocation59_spill] sm:$0xff]  ;;  %v2164_v24 = vcombine.high %v5835_v29, %v5838_v15  ;;  %v3410_v29 = vcombine.high %v5889_v51, %v5899_v18 }
 0x1db   : > { %7220 = vst [vmem:[#allocation19_spill] sm:$0xff] %v5939_v50  ;;  %v2027_v62 = vcombine.low %v5951_v58, %v5937_v10  ;;  %v1299_v53 = vcombine.low %v7222_v21, %v5953_v63  ;;  %v6031_v15 = vrot.slane %v1995_v25, %v4723_v20  ;;  %v2603_v51 = vcombine.low %v6021_v34, %v6004_v57 }
 0x1dc   : > { %2232 = vrot.lane.b32.xlu1 %v2196_v30, %s4388_s16  ;;  %3860 = vrot.lane.b32.xlu0 %v3698_v8, %s4393_s27  ;;  %v7224_v8 = vld [vmem:[#allocation56_spill] sm:$0xff]  ;;  %v2847_v3 = vcombine.low %v5977_v26, %v5980_v33  ;;  %v3234_v18 = vrot.slane %v3220_v12, %v4723_v20 }
 0x1dd   : > { %v6008_v56 = vrot.slane %v2027_v62, %v4723_v20  ;;  %v1283_v47 = vcombine.low %v7224_v8, %v5902_v42  ;;  %7225 = vst [vmem:[#allocation27_spill] sm:$0xff] %v6031_v15  ;;  %v6034_v62 = vrot.slane %v2508_v1, %v4590_v22  ;;  %v6039_v19 = vrot.slane %v1299_v53, %v4590_v22 }
 0x1de   : > { %v5972_v4 = vpop.permute.xlu1 %1125  ;;  %v5988_v30 = vpop.permute.xlu0 %1121  ;;  %v3273_v12 = vcombine.low %v3234_v18, %v6026_v38  ;;  %v6085_v42 = vrot.slane %v2603_v51, %v4723_v20 }
 0x1df   : > { %7221 = vst [vmem:[#allocation18_spill] sm:$0xff] %v5972_v4  ;;  %7223 = vst [vmem:[#allocation23_spill] sm:$0xff] %v6008_v56  ;;  %v1315_v0 = vcombine.low %v5939_v50, %v5972_v4  ;;  %v2932_v50 = vcombine.high %v5811_v41, %v5788_v36 }
 0x1e0   : > { %2664 = vrot.lane.b32.xlu1 %v2622_v49, %s4390_s26  ;;  %2632 = vrot.lane.b32.xlu0 %v2485_v55, %s4387_s7  ;;  %v2132_v49 = vcombine.high %v5832_v59, %v5816_v7  ;;  %v6054_v59 = vrot.slane %v1283_v47, %v4590_v22 }
 0x1e1   : > { %v6057_v25 = vrot.slane %v1315_v0, %v4590_v22  ;;  %v6109_v41 = vrot.slane %v2932_v50, %v4723_v20  ;;  %v2372_v50 = vcombine.high %v5577_v60, %v5605_v31  ;;  %v2848_v31 = vcombine.high %v5977_v26, %v5980_v33 }
 0x1e2   : > { %v6016_v16 = vpop.permute.xlu1 %1111  ;;  %v6023_v37 = vpop.permute.xlu0 %1129  ;;  %v1347_v47 = vcombine.low %v6054_v59, %v6039_v19 }
 0x1e3   : > { %v1331_v55 = vcombine.low %v5988_v30, %v6023_v37 }
 0x1e4   : > { %3032 = vrot.lane.b32.xlu1 %v2984_v40, %s4392_s30  ;;  %3000 = vrot.lane.b32.xlu0 %v2847_v3, %s4389_s17  ;;  %v6065_v40 = vrot.slane %v2164_v24, %v4723_v20  ;;  %v2571_v3 = vcombine.low %v6045_v13, %v6034_v62  ;;  %v2964_v24 = vcombine.high %v5779_v23, %v5791_v6 }
 0x1e5   : > { %v6060_v1 = vrot.slane %v1331_v55, %v4590_v22  ;;  %v2146_v55 = vrot.slane %v2132_v49, %v4723_v20  ;;  %v2060_v49 = vcombine.high %v6031_v15, %v6008_v56  ;;  %v6101_v6 = vrot.slane %v1347_v47, %v4723_v20  ;;  %v7268_v56 = vld [vmem:[#allocation38_spill] sm:$0xff] }
 0x1e6   : > { %v6062_v53 = vpop.permute.xlu1 %1119  ;;  %v6067_v9 = vpop.permute.xlu0 %1115  ;;  %v6098_v23 = vrot.slane %v2571_v3, %v4723_v20  ;;  %v2404_v3 = vcombine.high %v5634_v46, %v5659_v48  ;;  %v7234_v46 = vld [vmem:[#allocation43_spill] sm:$0xff] }
 0x1e7   : > { %v1379_v0 = vcombine.low %v6057_v25, %v6060_v1  ;;  %v2197_v8 = vcombine.low %v2146_v55, %v6065_v40  ;;  %7229 = vst [vmem:[#allocation59_spill] sm:$0xff] %v6101_v6 }
 0x1e8   : > { %3464 = vrot.lane.b32.xlu1 %v3410_v29, %s4393_s27  ;;  %3432 = vrot.lane.b32.xlu0 %v3273_v12, %s4391_s29  ;;  %v2623_v36 = vcombine.low %v6098_v23, %v6085_v42  ;;  %v6112_v12 = vrot.slane %v2964_v24, %v4723_v20 }
 0x1e9   : > { %v6090_v4 = vrot.slane %v1379_v0, %v4723_v20  ;;  %v2486_v0 = vcombine.high %v5970_v43, %v5958_v27  ;;  %v6135_v27 = vrot.slane %v2404_v3, %v4590_v22  ;;  %v2028_v43 = vcombine.high %v5951_v58, %v5937_v10  ;;  %v7238_v10 = vld [vmem:[#allocation36_spill] sm:$0xff]  ;;  %v7239_v58 = vld [vmem:[#allocation37_spill] sm:$0xff] }
 0x1ea   : > { %v6081_v7 = vpop.permute.xlu1 %1000  ;;  %v6092_v29 = vpop.permute.xlu0 %996  ;;  %v2985_v48 = vcombine.low %v6109_v41, %v6112_v12 }
 0x1eb   : > { %7226 = vst [vmem:[#allocation21_spill] sm:$0xff] %v6081_v7  ;;  %7227 = vst [vmem:[#allocation20_spill] sm:$0xff] %v6090_v4 }
 0x1ec   : > { %7228 = vst [vmem:[#allocation13_spill] sm:$0xff] %v6092_v29  ;;  %2236 = vrot.lane.b32.xlu1 %v2197_v8, %s4387_s7  ;;  %2204 = vrot.lane.b32.xlu0 %v2060_v49, %s4388_s16  ;;  %v7232_v49 = vld [vmem:[#allocation65_spill] sm:$0xff] }
 0x1ed   : > { %v2388_v24 = vcombine.high %v7232_v49, %v5632_v11  ;;  %v7235_v8 = vld [vmem:[#allocation45_spill] sm:$0xff]  ;;  %v6145_v11 = vrot.slane %v2372_v50, %v4590_v22  ;;  %v3274_v49 = vcombine.high %v3234_v18, %v6026_v38  ;;  %v2198_v38 = vcombine.high %v2146_v55, %v6065_v40 }
 0x1ee   : > { %v6104_v51 = vpop.permute.xlu1 %1008  ;;  %v6118_v47 = vpop.permute.xlu0 %1004 }
 0x1ef   : > { %7230 = vst [vmem:[#allocation90_spill] sm:$0xff] %v6104_v51  ;;  %7231 = vst [vmem:[#allocation91_spill] sm:$0xff] %v6118_v47  ;;  %v2356_v47 = vcombine.high %v7235_v8, %v7234_v46  ;;  %v1996_v8 = vcombine.high %v5964_v44, %v5948_v45 }
 0x1f0   : > { %2668 = vrot.lane.b32.xlu1 %v2623_v36, %s4389_s17  ;;  %2636 = vrot.lane.b32.xlu0 %v2486_v0, %s4390_s26  ;;  %v6148_v36 = vrot.slane %v2388_v24, %v4590_v22  ;;  %v1772_v0 = vcombine.high %v7239_v58, %v7238_v10  ;;  %v6166_v24 = vrot.slane %v2028_v43, %v4723_v20 }
 0x1f1   : > { %v6158_v26 = vrot.slane %v2356_v47, %v4590_v22  ;;  %v6173_v45 = vrot.slane %v1996_v8, %v4723_v20  ;;  %v7241_v47 = vld [vmem:[#allocation52_spill] sm:$0xff]  ;;  %v2828_v8 = vcombine.high %v5910_v35, %v5913_v5 }
 0x1f2   : > { %v6128_v51 = vpop.permute.xlu1 %1016  ;;  %v6139_v60 = vpop.permute.xlu0 %1012  ;;  %v2467_v33 = vcombine.low %v6148_v36, %v6135_v27 }
 0x1f3   : > { %7233 = vst [vmem:[#allocation65_spill] sm:$0xff] %v6128_v51  ;;  %7236 = vst [vmem:[#allocation43_spill] sm:$0xff] %v6139_v60  ;;  %v2435_v44 = vcombine.low %v6158_v26, %v6145_v11  ;;  %v2061_v43 = vcombine.low %v6173_v45, %v6166_v24  ;;  %v7247_v51 = vld [vmem:[#allocation47_spill] sm:$0xff]  ;;  %v7249_v60 = vld [vmem:[#allocation24_spill] sm:$0xff] }
 0x1f4   : > { %3036 = vrot.lane.b32.xlu1 %v2985_v48, %s4391_s29  ;;  %3004 = vrot.lane.b32.xlu0 %v2848_v31, %s4392_s30  ;;  %v2116_v48 = vcombine.high %v7241_v47, %v5803_v61  ;;  %v6185_v31 = vrot.slane %v2467_v33, %v4723_v20  ;;  %v7245_v61 = vld [vmem:[#allocation49_spill] sm:$0xff] }
 0x1f5   : > { %v6198_v55 = vrot.slane %v2435_v44, %v4723_v20  ;;  %v7248_v33 = vld [vmem:[#allocation25_spill] sm:$0xff] }
 0x1f6   : > { %v6153_v3 = vpop.permute.xlu1 %1024  ;;  %v6162_v50 = vpop.permute.xlu0 %1020  ;;  %v6205_v35 = vrot.slane %v2116_v48, %v4590_v22 }
 0x1f7   : > { %7237 = vst [vmem:[#allocation45_spill] sm:$0xff] %v6153_v3  ;;  %7240 = vst [vmem:[#allocation92_spill] sm:$0xff] %v6162_v50  ;;  %v7246_v50 = vld [vmem:[#allocation69_spill] sm:$0xff]  ;;  %v2487_v44 = vcombine.low %v6198_v55, %v6185_v31 }
 0x1f8   : > { %1808 = vrot.lane.b32.xlu1 %v1772_v0, %s4388_s16  ;;  %3436 = vrot.lane.b32.xlu0 %v3274_v49, %s4393_s27  ;;  %v2796_v0 = vcombine.high %v5929_v52, %v5907_v54  ;;  %v7244_v49 = vld [vmem:[#allocation70_spill] sm:$0xff]  ;;  %v2100_v40 = vcombine.high %v7247_v51, %v7246_v50  ;;  %v7251_v52 = vld [vmem:[#allocation48_spill] sm:$0xff]  ;;  %v2624_v51 = vcombine.high %v6098_v23, %v6085_v42 }
 0x1f9   : > { %v2084_v47 = vcombine.high %v7245_v61, %v7244_v49  ;;  %v7250_v54 = vld [vmem:[#allocation46_spill] sm:$0xff]  ;;  %v6221_v61 = vrot.slane %v2828_v8, %v4723_v20 }
 0x1fa   : > { %v6177_v46 = vpop.permute.xlu1 %1032  ;;  %v6180_v18 = vpop.permute.xlu0 %1028  ;;  %v2068_v7 = vcombine.high %v7251_v52, %v7250_v54  ;;  %v7253_v50 = vld [vmem:[#allocation30_spill] sm:$0xff]  ;;  %v7258_v52 = vld [vmem:[#allocation57_spill] sm:$0xff] }
 0x1fb   : > { %7242 = vst [vmem:[#allocation52_spill] sm:$0xff] %v6177_v46  ;;  %7243 = vst [vmem:[#allocation93_spill] sm:$0xff] %v6180_v18  ;;  %v1740_v46 = vcombine.high %v7249_v60, %v7248_v33  ;;  %v6218_v60 = vrot.slane %v2796_v0, %v4723_v20  ;;  %v6224_v48 = vrot.slane %v2084_v47, %v4590_v22 }
 0x1fc   : > { %2240 = vrot.lane.b32.xlu1 %v2198_v38, %s4390_s26  ;;  %2208 = vrot.lane.b32.xlu0 %v2061_v43, %s4387_s7  ;;  %v7254_v38 = vld [vmem:[#allocation29_spill] sm:$0xff]  ;;  %v6227_v33 = vrot.slane %v2100_v40, %v4590_v22  ;;  %v6235_v23 = vrot.slane %v2068_v7, %v4590_v22  ;;  %v2986_v47 = vcombine.high %v6109_v41, %v6112_v12  ;;  %v7260_v41 = vld [vmem:[#allocation54_spill] sm:$0xff] }
 0x1fd   : > { %v1708_v43 = vcombine.high %v7254_v38, %v7253_v50  ;;  %v6232_v42 = vrot.slane %v1740_v46, %v4723_v20  ;;  %v2849_v46 = vcombine.low %v6218_v60, %v6221_v61  ;;  %v7259_v50 = vld [vmem:[#allocation60_spill] sm:$0xff]  ;;  %v2604_v38 = vcombine.high %v6021_v34, %v6004_v57 }
 0x1fe   : > { %v6207_v5 = vpop.permute.xlu1 %1040  ;;  %v6213_v49 = vpop.permute.xlu0 %1036  ;;  %v2179_v0 = vcombine.low %v6227_v33, %v6205_v35  ;;  %v2147_v7 = vcombine.low %v6235_v23, %v6224_v48  ;;  %v1147_v12 = vcombine.low %v7260_v41, %v7259_v50  ;;  %v2572_v18 = vcombine.high %v6045_v13, %v6034_v62 }
 0x1ff   : > { %7252 = vst [vmem:[#allocation70_spill] sm:$0xff] %v6207_v5  ;;  %7255 = vst [vmem:[#allocation49_spill] sm:$0xff] %v6213_v49  ;;  %v6244_v40 = vrot.slane %v1708_v43, %v4723_v20  ;;  %v7262_v5 = vld [vmem:[#allocation40_spill] sm:$0xff] }
 0x200   : > { %2672 = vrot.lane.b32.xlu1 %v2624_v51, %s4392_s30  ;;  %2640 = vrot.lane.b32.xlu0 %v2487_v44, %s4389_s17  ;;  %v1163_v51 = vcombine.low %v7258_v52, %v6016_v16  ;;  %v6289_v29 = vrot.slane %v1147_v12, %v4590_v22 }
 0x201   : > { %v1773_v44 = vcombine.low %v6244_v40, %v6232_v42 }
 0x202   : > { %v6239_v8 = vpop.permute.xlu1 %1048  ;;  %v6246_v54 = vpop.permute.xlu0 %1044  ;;  %v6276_v57 = vrot.slane %v1163_v51, %v4590_v22 }
 0x203   : > { %7256 = vst [vmem:[#allocation69_spill] sm:$0xff] %v6239_v8  ;;  %7257 = vst [vmem:[#allocation47_spill] sm:$0xff] %v6246_v54  ;;  %v6265_v8 = vrot.slane %v2179_v0, %v4723_v20  ;;  %v6282_v0 = vrot.slane %v2147_v7, %v4723_v20 }
 0x204   : > { %3040 = vrot.lane.b32.xlu1 %v2986_v47, %s4393_s27  ;;  %3008 = vrot.lane.b32.xlu0 %v2849_v46, %s4391_s29  ;;  %v7261_v46 = vld [vmem:[#allocation41_spill] sm:$0xff]  ;;  %v1211_v12 = vcombine.low %v6289_v29, %v6276_v57 }
 0x205   : > { %v1636_v49 = vcombine.high %v7262_v5, %v7261_v46  ;;  %v2199_v51 = vcombine.low %v6282_v0, %v6265_v8  ;;  %v6313_v46 = vrot.slane %v2572_v18, %v4723_v20 }
 0x206   : > { %v6260_v43 = vpop.permute.xlu1 %1127  ;;  %v6269_v47 = vpop.permute.xlu0 %1123 }
 0x207   : > { %v1195_v54 = vcombine.low %v6062_v53, %v6260_v43  ;;  %v1179_v34 = vcombine.low %v6067_v9, %v6269_v47 }
 0x208   : > { %1812 = vrot.lane.b32.xlu1 %v1773_v44, %s4387_s7  ;;  %1780 = vrot.lane.b32.xlu0 %v1636_v49, %s4388_s16  ;;  %v6299_v44 = vrot.slane %v2604_v38, %v4723_v20  ;;  %v2062_v49 = vcombine.high %v6173_v45, %v6166_v24  ;;  %v1948_v38 = vcombine.high %v5845_v17, %v5873_v32  ;;  %v7265_v24 = vld [vmem:[#allocation31_spill] sm:$0xff]  ;;  %v7266_v45 = vld [vmem:[#allocation28_spill] sm:$0xff]  ;;  %v7270_v17 = vld [vmem:[#allocation50_spill] sm:$0xff] }
 0x209   : > { %v6285_v3 = vrot.slane %v1195_v54, %v4590_v22  ;;  %v6292_v62 = vrot.slane %v1179_v34, %v4590_v22  ;;  %v1980_v54 = vcombine.high %v5893_v28, %v5921_v14  ;;  %v7264_v28 = vld [vmem:[#allocation53_spill] sm:$0xff]  ;;  %v1604_v5 = vcombine.high %v7266_v45, %v7265_v24 }
 0x20a   : > { %v6294_v13 = vpop.permute.xlu1 %3836  ;;  %v6303_v7 = vpop.permute.xlu0 %3864  ;;  %v1964_v14 = vcombine.high %v7264_v28, %v5884_v39  ;;  %v2625_v58 = vcombine.low %v6313_v46, %v6299_v44  ;;  %v1932_v32 = vcombine.high %v7270_v17, %v5840_v2  ;;  %v7272_v28 = vld [vmem:[#allocation75_spill] sm:$0xff]  ;;  %v6349_v2 = vrot.slane %v1948_v38, %v4590_v22 }
 0x20b   : > { %7263 = vst [vmem:[#allocation25_spill] sm:$0xff] %v6294_v13  ;;  %v1243_v34 = vcombine.low %v6292_v62, %v6285_v3  ;;  %v6332_v39 = vrot.slane %v1980_v54, %v4590_v22 }
 0x20c   : > { %2244 = vrot.lane.b32.xlu1 %v2199_v51, %s4389_s17  ;;  %2212 = vrot.lane.b32.xlu0 %v2062_v49, %s4390_s26  ;;  %v7267_v51 = vld [vmem:[#allocation39_spill] sm:$0xff]  ;;  %v7271_v49 = vld [vmem:[#allocation74_spill] sm:$0xff]  ;;  %v6352_v54 = vrot.slane %v1964_v14, %v4590_v22  ;;  %v2850_v14 = vcombine.high %v6218_v60, %v6221_v61  ;;  %v2468_v60 = vcombine.high %v6148_v36, %v6135_v27 }
 0x20d   : > { %v1572_v18 = vcombine.high %v7268_v56, %v7267_v51  ;;  %v6327_v15 = vrot.slane %v1243_v34, %v4723_v20  ;;  %v7273_v24 = vcombine.low %v7271_v49, %v7272_v28  ;;  %v2488_v56 = vcombine.high %v6198_v55, %v6185_v31  ;;  %v4248_v49 = vld [vmem:[#allocation2 + $0x85] ss:$48 sps:$4 sm:$0xff]  }
 0x20e   : > { %v3441_v10 = vpop.permute.xlu1 %3440  ;;  %v6340_v13 = vpop.permute.xlu0 %3868  ;;  %v6346_v34 = vrot.slane %v1211_v12, %v4723_v20  ;;  %v1412_v51 = vcombine.high %v6101_v6, %v6090_v4  ;;  %v6360_v31 = vrot.slane %v1604_v5, %v4723_v20  ;;  %v6365_v55 = vrot.slane %v1932_v32, %v4590_v22  ;;  %v4247_v32 = vld [vmem:[#allocation2 + $0x6d] ss:$48 sps:$4 sm:$0xff]  }
 0x20f   : > { %7269 = vst [vmem:[#allocation24_spill] sm:$0xff] %v6327_v15  ;;  %v6338_v45 = vsel %vm620_vm9, %v7273_v24, %v3441_v10  ;;  %v2043_v12 = vcombine.low %v6352_v54, %v6332_v39  ;;  %v6374_v17 = vrot.slane %v1572_v18, %v4723_v20  ;;  %v1774_v24 = vcombine.high %v6244_v40, %v6232_v42 }
 0x210   : > { %7274 = vst [vmem:[#allocation46_spill] sm:$0xff] %v6338_v45  ;;  %2676 = vrot.lane.b32.xlu1 %v2625_v58, %s4391_s29  ;;  %2644 = vrot.lane.b32.xlu0 %v2488_v56, %s4392_s30  ;;  %v2011_v5 = vcombine.low %v6365_v55, %v6349_v2  ;;  %v4246_v56 = vld [vmem:[#allocation2 + $0x25] ss:$48 sps:$4 sm:$0xff]   ;;  %v4245_v45 = vld [vmem:[#allocation2 + $0xd] ss:$48 sps:$4 sm:$0xff]   ;;  %v2436_v42 = vcombine.high %v6158_v26, %v6145_v11 }
 0x211   : > { %v1637_v18 = vcombine.low %v6374_v17, %v6360_v31  ;;  %v7275_v58 = vld [vmem:[#allocation42_spill] sm:$0xff]  ;;  %v6403_v36 = vrot.slane %v4247_v32, %v4590_v22  ;;  %v6406_v40 = vrot.slane %v4248_v49, %v4590_v22  ;;  %v6415_v11 = vrot.slane %v4246_v56, %v4590_v22 }
 0x212   : > { %v6355_v10 = vpop.permute.xlu1 %3872  ;;  %v6369_v38 = vpop.permute.xlu0 %3840  ;;  %v6400_v27 = vrot.slane %v2011_v5, %v4723_v20  ;;  %v6422_v32 = vrot.slane %v2468_v60, %v4723_v20  ;;  %v1348_v49 = vcombine.high %v6054_v59, %v6039_v19 }
 0x214   : > { %1448 = vrot.lane.b32.xlu1 %v1412_v51, %s4388_s16  ;;  %3012 = vrot.lane.b32.xlu0 %v2850_v14, %s4393_s27  ;;  %v6389_v51 = vrot.slane %v2043_v12, %v4723_v20  ;;  %v7276_v14 = vld [vmem:[#allocation44_spill] sm:$0xff]  ;;  %v2200_v12 = vcombine.high %v6282_v0, %v6265_v8  ;;  %v1755_v8 = vcombine.low %v6403_v36, %v6406_v40 }
 0x215   : > { %v7277_v4 = vcombine.low %v7275_v58, %v7276_v14 }
 0x216   : > { %v6380_v28 = vpop.permute.xlu1 %3444  ;;  %v3413_v61 = vpop.permute.xlu0 %3412  ;;  %v2063_v5 = vcombine.low %v6400_v27, %v6389_v51 }
 0x217   : > { %v3467_v6 = vsel %vm620_vm9, %v7277_v4, %v3413_v61  ;;  %v1380_v4 = vcombine.high %v6057_v25, %v6060_v1  ;;  %v6428_v25 = vrot.slane %v4245_v45, %v4590_v22  ;;  %v6432_v1 = vrot.slane %v2436_v42, %v4723_v20  ;;  %v7278_v61 = vld [vmem:[#allocation34_spill] sm:$0xff] }
 0x218   : > { %1816 = vrot.lane.b32.xlu1 %v1774_v24, %s4390_s26  ;;  %1784 = vrot.lane.b32.xlu0 %v1637_v18, %s4387_s7  ;;  %v2626_v24 = vcombine.high %v6313_v46, %v6299_v44  ;;  %v7279_v18 = vld [vmem:[#allocation32_spill] sm:$0xff]  ;;  %v6454_v46 = vrot.slane %v1348_v49, %v4723_v20 }
 0x219   : > { %v6439_v19 = vrot.slane %v1380_v4, %v4723_v20  ;;  %v1723_v59 = vcombine.low %v6428_v25, %v6415_v11  ;;  %v2489_v60 = vcombine.low %v6432_v1, %v6422_v32  ;;  %v7280_v14 = vcombine.low %v7278_v61, %v7279_v18  ;;  %v4251_v44 = vld [vmem:[#allocation2 + $0x65] ss:$48 sps:$4 sm:$0xff]   ;;  %v4252_v4 = vld [vmem:[#allocation2 + $0x7d] ss:$48 sps:$4 sm:$0xff]  }
 0x21a   : > { %v6410_v58 = vpop.permute.xlu1 %3876  ;;  %v6417_v26 = vpop.permute.xlu0 %3844  ;;  %v4250_v49 = vld [vmem:[#allocation2 + $0x1d] ss:$48 sps:$4 sm:$0xff]   ;;  %v1244_v61 = vcombine.high %v6292_v62, %v6285_v3  ;;  %v1638_v3 = vcombine.high %v6374_v17, %v6360_v31  ;;  %v1212_v62 = vcombine.high %v6289_v29, %v6276_v57 }
 0x21c   : > { %2248 = vrot.lane.b32.xlu1 %v2200_v12, %s4392_s30  ;;  %2216 = vrot.lane.b32.xlu0 %v2063_v5, %s4389_s17  ;;  %v1413_v5 = vcombine.low %v6454_v46, %v6439_v19  ;;  %v6516_v31 = vrot.slane %v1244_v61, %v4723_v20  ;;  %v2044_v61 = vcombine.high %v6352_v54, %v6332_v39 }
 0x21d   : > { %v2012_v39 = vcombine.high %v6365_v55, %v6349_v2  ;;  %v1300_v54 = vcombine.high %v7222_v21, %v5953_v63  ;;  %v7289_v63 = vld [vmem:[#allocation63_spill] sm:$0xff] }
 0x21e   : > { %v3417_v0 = vpop.permute.xlu1 %3416  ;;  %v3017_v56 = vpop.permute.xlu0 %3016 }
 0x21f   : > { %v6444_v45 = vsel %vm622_vm10, %v3467_v6, %v3417_v0  ;;  %v3050_v42 = vsel %vm620_vm9, %v7280_v14, %v3017_v56  ;;  %v2180_v6 = vcombine.high %v6227_v33, %v6205_v35  ;;  %v6464_v0 = vrot.slane %v1723_v59, %v4723_v20  ;;  %v4249_v33 = vld [vmem:[#allocation2 + $0x5] ss:$48 sps:$4 sm:$0xff]  }
 0x220   : > { %2680 = vrot.lane.b32.xlu1 %v2626_v24, %s4393_s27  ;;  %2648 = vrot.lane.b32.xlu0 %v2489_v60, %s4391_s29  ;;  %v6467_v24 = vrot.slane %v1755_v8, %v4723_v20  ;;  %v1276_v60 = vcombine.high %v6346_v34, %v6327_v15  ;;  %v2148_v35 = vcombine.high %v6235_v23, %v6224_v48 }
 0x221   : > { %v6478_v59 = vrot.slane %v4251_v44, %v4590_v22  ;;  %v6481_v8 = vrot.slane %v4252_v4, %v4590_v22  ;;  %v6488_v48 = vrot.slane %v2180_v6, %v4723_v20  ;;  %v6491_v23 = vrot.slane %v4250_v49, %v4590_v22 }
 0x222   : > { %v6459_v12 = vpop.permute.xlu1 %3848  ;;  %v6469_v56 = vpop.permute.xlu0 %3448  ;;  %v1775_v14 = vcombine.low %v6464_v0, %v6467_v24  ;;  %v6505_v6 = vrot.slane %v2148_v35, %v4723_v20  ;;  %v6508_v49 = vrot.slane %v4249_v33, %v4590_v22  ;;  %v2064_v35 = vcombine.high %v6400_v27, %v6389_v51 }
 0x223   : > { %v1619_v57 = vcombine.low %v6478_v59, %v6481_v8  ;;  %v1332_v27 = vcombine.high %v5988_v30, %v6023_v37  ;;  %v6558_v37 = vrot.slane %v2044_v61, %v4723_v20  ;;  %v6575_v61 = vrot.slane %v2012_v39, %v4723_v20 }
 0x224   : > { %1452 = vrot.lane.b32.xlu1 %v1413_v5, %s4387_s7  ;;  %1420 = vrot.lane.b32.xlu0 %v1276_v60, %s4388_s16  ;;  %v7281_v5 = vld [vmem:[#allocation35_spill] sm:$0xff]  ;;  %v7282_v60 = vld [vmem:[#allocation33_spill] sm:$0xff]  ;;  %v1587_v29 = vcombine.low %v6508_v49, %v6491_v23 }
 0x225   : > { %v7283_v44 = vcombine.low %v7281_v5, %v7282_v60  ;;  %v6539_v51 = vrot.slane %v1619_v57, %v4723_v20  ;;  %v6563_v55 = vrot.slane %v1332_v27, %v4590_v22 }
 0x226   : > { %v2989_v18 = vpop.permute.xlu1 %2988  ;;  %v6497_v4 = vpop.permute.xlu0 %3880 }
 0x227   : > { %v3043_v15 = vsel %vm620_vm9, %v7283_v44, %v2989_v18  ;;  %v2201_v18 = vcombine.low %v6505_v6, %v6488_v48 }
 0x228   : > { %1820 = vrot.lane.b32.xlu1 %v1775_v14, %s4389_s17  ;;  %1788 = vrot.lane.b32.xlu0 %v1638_v3, %s4390_s26  ;;  %v1226_v14 = vrot.slane %v1212_v62, %v4723_v20  ;;  %v6536_v3 = vrot.slane %v1587_v29, %v4723_v20  ;;  %v2490_v62 = vcombine.high %v6432_v1, %v6422_v32  ;;  %v7285_v29 = vld [vmem:[#allocation19_spill] sm:$0xff]  ;;  %v7286_v32 = vld [vmem:[#allocation26_spill] sm:$0xff]  ;;  %v7287_v1 = vld [vmem:[#allocation56_spill] sm:$0xff] }
 0x229   : > { %v1284_v2 = vcombine.high %v7287_v1, %v7286_v32 }
 0x22a   : > { %v6511_v5 = vpop.permute.xlu1 %3420  ;;  %v3021_v17 = vpop.permute.xlu0 %3020  ;;  %v1277_v44 = vcombine.low %v1226_v14, %v6516_v31  ;;  %v1639_v30 = vcombine.low %v6536_v3, %v6539_v51 }
 0x22b   : > { %v6525_v33 = vsel %vm622_vm10, %v3050_v42, %v3021_v17 }
 0x22c   : > { %2252 = vrot.lane.b32.xlu1 %v2201_v18, %s4391_s29  ;;  %2220 = vrot.lane.b32.xlu0 %v2064_v35, %s4392_s30  ;;  %v7284_v18 = vld [vmem:[#allocation18_spill] sm:$0xff]  ;;  %v7288_v35 = vld [vmem:[#allocation64_spill] sm:$0xff] }
 0x22d   : > { %v1316_v57 = vcombine.high %v7285_v29, %v7284_v18  ;;  %v7290_v21 = vcombine.low %v7288_v35, %v7289_v63  ;;  %v1414_v18 = vcombine.high %v6454_v46, %v6439_v19  ;;  %v6578_v29 = vrot.slane %v1300_v54, %v4590_v22 }
 0x22e   : > { %v6532_v60 = vpop.permute.xlu1 %3852  ;;  %v6543_v42 = vpop.permute.xlu0 %3452  ;;  %v1776_v19 = vcombine.high %v6464_v0, %v6467_v24  ;;  %v6591_v46 = vrot.slane %v1284_v2, %v4590_v22  ;;  %v1196_v54 = vcombine.high %v6062_v53, %v6260_v43  ;;  %v1756_v0 = vcombine.high %v6403_v36, %v6406_v40  ;;  %v7291_v43 = vld [vmem:[#allocation66_spill] sm:$0xff] }
 0x22f   : > { %v6581_v27 = vrot.slane %v1316_v57, %v4590_v22  ;;  %v1180_v57 = vcombine.high %v6067_v9, %v6269_v47  ;;  %v1164_v53 = vcombine.high %v7258_v52, %v6016_v16  ;;  %v7292_v9 = vld [vmem:[#allocation67_spill] sm:$0xff]  ;;  %v1148_v36 = vcombine.high %v7260_v41, %v7259_v50 }
 0x230   : > { %1424 = vrot.lane.b32.xlu1 %v1277_v44, %s4387_s7  ;;  %2652 = vrot.lane.b32.xlu0 %v2490_v62, %s4393_s27  ;;  %v1363_v24 = vcombine.low %v6591_v46, %v6578_v29  ;;  %v7293_v47 = vcombine.low %v7291_v43, %v7292_v9  ;;  %v1278_v16 = vcombine.high %v1226_v14, %v6516_v31  ;;  %v7295_v43 = vld [vmem:[#allocation68_spill] sm:$0xff] }
 0x231   : > { %v1395_v39 = vcombine.low %v6581_v27, %v6563_v55  ;;  %v2202_v52 = vcombine.high %v6505_v6, %v6488_v48  ;;  %v6630_v63 = vrot.slane %v1180_v57, %v4590_v22  ;;  %v6642_v48 = vrot.slane %v1164_v53, %v4590_v22  ;;  %v7294_v53 = vld [vmem:[#allocation71_spill] sm:$0xff] }
 0x232   : > { %v2657_v17 = vpop.permute.xlu1 %2656  ;;  %v3885_v62 = vpop.permute.xlu0 %3884  ;;  %v3898_v2 = vsel %vm620_vm9, %v7293_v47, %v6303_v7  ;;  %v6627_v7 = vrot.slane %v1196_v54, %v4590_v22  ;;  %v7296_v9 = vcombine.low %v7294_v53, %v7295_v43 }
 0x233   : > { %v6569_v44 = vsel %vm620_vm9, %v7290_v21, %v2657_v17  ;;  %v2065_v17 = vcombine.low %v6575_v61, %v6558_v37  ;;  %v3899_v40 = vsel %vm622_vm10, %v3898_v2, %v6340_v13  ;;  %v1403_v41 = vrot.slane %v1395_v39, %v4723_v20 }
 0x234   : > { %1792 = vrot.lane.b32.xlu1 %v1639_v30, %s4389_s17  ;;  %1456 = vrot.lane.b32.xlu0 %v1414_v18, %s4390_s26  ;;  %v1162_v18 = vrot.slane %v1148_v36, %v4590_v22  ;;  %v1620_v22 = vcombine.high %v6478_v59, %v6481_v8  ;;  %v1396_v8 = vcombine.high %v6581_v27, %v6563_v55  ;;  %v7297_v27 = vld [vmem:[#allocation25_spill] sm:$0xff]  ;;  %v7298_v36 = vld [vmem:[#allocation72_spill] sm:$0xff] }
 0x235   : > { %v1260_v55 = vcombine.high %v6630_v63, %v6627_v7 }
 0x236   : > { %v6584_v32 = vpop.permute.xlu1 %3024  ;;  %v2993_v30 = vpop.permute.xlu0 %2992  ;;  %v1634_v2 = vrot.slane %v1620_v22, %v4723_v20 }
 0x237   : > { %v6600_v1 = vsel %vm622_vm10, %v3043_v15, %v2993_v30  ;;  %v1724_v15 = vcombine.high %v6428_v25, %v6415_v11  ;;  %v3900_v11 = vsel %vm624_vm11, %v3899_v40, %v6355_v10  ;;  %v1770_v25 = vrot.slane %v1756_v0, %v4723_v20  ;;  %v7299_v40 = vld [vmem:[#allocation73_spill] sm:$0xff] }
 0x238   : > { %2224 = vrot.lane.b32.xlu1 %v2065_v17, %s4391_s29  ;;  %1824 = vrot.lane.b32.xlu0 %v1776_v19, %s4392_s30  ;;  %v3901_v13 = vsel %vm626_vm12, %v3900_v11, %v6410_v58  ;;  %v1371_v10 = vrot.slane %v1363_v24, %v4723_v20  ;;  %v1640_v58 = vcombine.high %v6536_v3, %v6539_v51 }
 0x239   : > { %v3902_v6 = vsel %vm628_vm13, %v3901_v13, %v6497_v4  ;;  %v1738_v21 = vrot.slane %v1724_v15, %v4723_v20  ;;  %v1259_v17 = vcombine.low %v6630_v63, %v6627_v7  ;;  %v2066_v51 = vcombine.high %v6575_v61, %v6558_v37 }
 0x23a   : > { %v6621_v35 = vpop.permute.xlu1 %3456  ;;  %v6634_v50 = vpop.permute.xlu0 %3424  ;;  %v3903_v31 = vsel %vm630_vm14, %v3902_v6, %v3885_v62  ;;  %v1415_v4 = vcombine.low %v1371_v10, %v1403_v41  ;;  %v1227_v62 = vcombine.low %v1162_v18, %v6642_v48  ;;  %v1588_v24 = vcombine.high %v6508_v49, %v6491_v23 }
 0x23b   : > { %v1777_v30 = vcombine.low %v1738_v21, %v1770_v25  ;;  %v1267_v0 = vrot.slane %v1259_v17, %v4723_v20  ;;  %v1364_v15 = vcombine.high %v6591_v46, %v6578_v29  ;;  %v1410_v13 = vrot.slane %v1396_v8, %v4723_v20 }
 0x23c   : > { %1428 = vrot.lane.b32.xlu1 %v1278_v16, %s4390_s26  ;;  %2256 = vrot.lane.b32.xlu0 %v2202_v52, %s4393_s27  ;;  %v1235_v59 = vrot.slane %v1227_v62, %v4723_v20  ;;  %v1602_v49 = vrot.slane %v1588_v24, %v4723_v20  ;;  %v7300_v16 = vcombine.low %v7298_v36, %v7299_v40 }
 0x23d   : > { %v1378_v63 = vrot.slane %v1364_v15, %v4723_v20 }
 0x23e   : > { %v3889_v14 = vpop.permute.xlu1 %3888  ;;  %v3857_v19 = vpop.permute.xlu0 %3856  ;;  %v1279_v23 = vcombine.low %v1235_v59, %v1267_v0  ;;  %v3891_v52 = vsel %vm620_vm9, %v7300_v16, %v7297_v27  ;;  %v1641_v6 = vcombine.low %v1602_v49, %v1634_v2  ;;  %v3469_v16 = vsel %vm624_vm11, %v6444_v45, %v6511_v5 }
 0x23f   : > { %v3904_v39 = vsel %vm632_vm15, %v3903_v31, %v3889_v14  ;;  %v3892_v29 = vsel %vm622_vm10, %v3891_v52, %v6369_v38  ;;  %v1417_v14 = vcombine.low %v1378_v63, %v1410_v13  ;;  %v1418_v43 = vcombine.high %v1378_v63, %v1410_v13 }
 0x240   : > { %1796 = vrot.lane.b32.xlu1 %v1640_v58, %s4392_s30  ;;  %3951 = vmatprep.subr.mxu0 %v3904_v39  ;;  %v3893_v7 = vsel %vm624_vm11, %v3892_v29, %v6417_v26  ;;  %v1274_v58 = vrot.slane %v1260_v55, %v4723_v20  ;;  %v7302_v26 = vld [vmem:[#allocation51_spill] sm:$0xff]  ;;  %v1280_v39 = vcombine.high %v1235_v59, %v1267_v0  ;;  %v7308_v29 = vld [vmem:[#allocation37_spill] sm:$0xff] }
 0x241   : > { %1460 = vrot.lane.b32.xlu0 %v1415_v4, %s4389_s17  ;;  %v3894_v31 = vsel %vm626_vm12, %v3893_v7, %v6459_v12  ;;  %v3470_v52 = vsel %vm626_vm12, %v3469_v16, %v6634_v50 }
 0x242   : > { %v2661_v3 = vpop.permute.xlu1 %2660  ;;  %v2629_v57 = vpop.permute.xlu0 %2628 }
 0x243   : > { %v6665_v54 = vsel %vm622_vm10, %v6569_v44, %v2661_v3  ;;  %v2683_v47 = vsel %vm620_vm9, %v7296_v9, %v2629_v57  ;;  %v1416_v44 = vcombine.high %v1371_v10, %v1403_v41  ;;  %v1778_v41 = vcombine.high %v1738_v21, %v1770_v25  ;;  %v7301_v21 = vld [vmem:[#allocation22_spill] sm:$0xff] }
 0x244   : > { %2228 = vrot.lane.b32.xlu1 %v2066_v51, %s4393_s27  ;;  %v1228_v10 = vcombine.high %v1162_v18, %v6642_v48  ;;  %v3895_v25 = vsel %vm628_vm13, %v3894_v31, %v6532_v60  ;;  %v7303_v18 = vcombine.low %v7301_v21, %v7302_v26  ;;  %v1642_v51 = vcombine.high %v1602_v49, %v1634_v2  ;;  %v7304_v57 = vld [vmem:[#allocation46_spill] sm:$0xff]  ;;  %v7306_v2 = vld [vmem:[#allocation23_spill] sm:$0xff] }
 0x245   : > { %1828 = vrot.lane.b32.xlu0 %v1777_v30, %s4391_s29  ;;  %v3896_v48 = vsel %vm630_vm14, %v3895_v25, %v3857_v19  ;;  %v3475_v30 = vsel %vm622_vm10, %v7304_v57, %v6380_v28 }
 0x246   : > { %v6679_v37 = vpop.permute.xlu1 %3028  ;;  %v6681_v61 = vpop.permute.xlu0 %2996  ;;  %v1242_v62 = vrot.slane %v1228_v10, %v4723_v20  ;;  %v3476_v24 = vsel %vm624_vm11, %v3475_v30, %v6469_v56 }
 0x247   : > { %v3477_v9 = vsel %vm626_vm12, %v3476_v24, %v6543_v42  ;;  %v7305_v42 = vld [vmem:[#allocation27_spill] sm:$0xff] }
 0x248   : > { %1464 = vrot.lane.b32.xlu1 %v1416_v44, %s4392_s30  ;;  %v1281_v3 = vcombine.low %v1242_v62, %v1274_v58  ;;  %v1282_v0 = vcombine.high %v1242_v62, %v1274_v58  ;;  %v7307_v15 = vcombine.low %v7305_v42, %v7306_v2 }
 0x249   : > { %1432 = vrot.lane.b32.xlu0 %v1279_v23, %s4389_s17 }
 0x24a   : > { %v3461_v11 = vpop.permute.xlu1 %3460  ;;  %v3429_v46 = vpop.permute.xlu0 %3428 }
 0x24c   : > { %1832 = vrot.lane.b32.xlu1 %v1778_v41, %s4393_s27 }
 0x24d   : > { %1800 = vrot.lane.b32.xlu0 %v1641_v6, %s4391_s29  ;;  %v7309_v6 = vld [vmem:[#allocation36_spill] sm:$0xff] }
 0x24e   : > { %v2233_v38 = vpop.permute.xlu1 %2232  ;;  %v3861_v4 = vpop.permute.xlu0 %3860  ;;  %v7310_v10 = vcombine.low %v7308_v29, %v7309_v6 }
 0x24f   : > { %v2266_v17 = vsel %vm620_vm9, %v7303_v18, %v2233_v38  ;;  %v3897_v12 = vsel %vm632_vm15, %v3896_v48, %v3861_v4 }
 0x250   : > { %1468 = vrot.lane.b32.xlu1 %v1417_v14, %s4391_s29  ;;  %3952 = vmatpush1.msra.mxu0 %v3897_v12  ;;  %v7312_v12 = vld [vmem:[#allocation41_spill] sm:$0xff] }
 0x251   : > { %1436 = vrot.lane.b32.xlu0 %v1280_v39, %s4392_s30  ;;  %v7311_v39 = vld [vmem:[#allocation40_spill] sm:$0xff] }
 0x252   : > { %v6719_v60 = vpop.permute.xlu1 %2664  ;;  %v2633_v19 = vpop.permute.xlu0 %2632  ;;  %v7313_v62 = vcombine.low %v7311_v39, %v7312_v12 }
 0x253   : > { %v6722_v22 = vsel %vm622_vm10, %v2683_v47, %v2633_v19  ;;  %v3478_v47 = vsel %vm628_vm13, %v3477_v9, %v6621_v35 }
 0x254   : > { %1440 = vrot.lane.b32.xlu1 %v1281_v3, %s4391_s29  ;;  %v3479_v59 = vsel %vm630_vm14, %v3478_v47, %v3461_v11  ;;  %v3471_v11 = vsel %vm628_vm13, %v3470_v52, %v3429_v46  ;;  %v3052_v46 = vsel %vm624_vm11, %v6525_v33, %v6584_v32 }
 0x255   : > { %1804 = vrot.lane.b32.xlu0 %v1642_v51, %s4393_s27  ;;  %v3053_v14 = vsel %vm626_vm12, %v3052_v46, %v6679_v37  ;;  %v3045_v51 = vsel %vm624_vm11, %v6600_v1, %v6681_v61  ;;  %v2692_v1 = vsel %vm624_vm11, %v6665_v54, %v6719_v60 }
 0x256   : > { %v3033_v20 = vpop.permute.xlu1 %3032  ;;  %v3001_v53 = vpop.permute.xlu0 %3000 }
 0x257   : > { %v3054_v58 = vsel %vm628_vm13, %v3053_v14, %v3033_v20  ;;  %v3046_v57 = vsel %vm626_vm12, %v3045_v51, %v3001_v53 }
 0x258   : > { %1444 = vrot.lane.b32.xlu1 %v1282_v0, %s4393_s27 }
 0x259   : > { %1472 = vrot.lane.b32.xlu0 %v1418_v43, %s4393_s27 }
 0x25a   : > { %v3465_v28 = vpop.permute.xlu1 %3464  ;;  %v3433_v8 = vpop.permute.xlu0 %3432 }
 0x25b   : > { %v3480_v44 = vsel %vm632_vm15, %v3479_v59, %v3465_v28  ;;  %v3472_v13 = vsel %vm630_vm14, %v3471_v11, %v3433_v8 }
 0x25c   : > { %3953 = vmatprep.subr.mxu0 %v3480_v44 }
 0x25e   : > { %v2237_v56 = vpop.permute.xlu1 %2236  ;;  %v2205_v49 = vpop.permute.xlu0 %2204 }
 0x25f   : > { %v6740_v23 = vsel %vm622_vm10, %v2266_v17, %v2237_v56  ;;  %v2259_v55 = vsel %vm620_vm9, %v7307_v15, %v2205_v49 }
 0x262   : > { %v2669_v35 = vpop.permute.xlu1 %2668  ;;  %v2637_v27 = vpop.permute.xlu0 %2636 }
 0x263   : > { %v2693_v53 = vsel %vm626_vm12, %v2692_v1, %v2669_v35  ;;  %v2685_v54 = vsel %vm624_vm11, %v6722_v22, %v2637_v27 }
 0x266   : > { %v3037_v36 = vpop.permute.xlu1 %3036  ;;  %v3005_v40 = vpop.permute.xlu0 %3004 }
 0x267   : > { %v3055_v48 = vsel %vm630_vm14, %v3054_v58, %v3037_v36  ;;  %v3047_v30 = vsel %vm628_vm13, %v3046_v57, %v3005_v40  ;;  %v7314_v57 = vld [vmem:[#allocation77_spill] sm:$0xff] }
 0x26a   : > { %v1809_v41 = vpop.permute.xlu1 %1808  ;;  %v3437_v63 = vpop.permute.xlu0 %3436 }
 0x26b   : > { %v6757_v7 = vsel %vm620_vm9, %v7310_v10, %v1809_v41  ;;  %v3473_v31 = vsel %vm632_vm15, %v3472_v13, %v3437_v63 }
 0x26c   : > { %3954 = vmatpush1.msra.mxu0 %v3473_v31 }
 0x26e   : > { %v2241_v25 = vpop.permute.xlu1 %2240  ;;  %v2209_v45 = vpop.permute.xlu0 %2208 }
 0x26f   : > { %v6761_v5 = vsel %vm622_vm10, %v2259_v55, %v2209_v45  ;;  %v2268_v63 = vsel %vm624_vm11, %v6740_v23, %v2241_v25 }
 0x272   : > { %v2673_v50 = vpop.permute.xlu1 %2672  ;;  %v2641_v38 = vpop.permute.xlu0 %2640 }
 0x273   : > { %v2694_v28 = vsel %vm628_vm13, %v2693_v53, %v2673_v50  ;;  %v2686_v60 = vsel %vm626_vm12, %v2685_v54, %v2641_v38  ;;  %v7323_v53 = vld [vmem:[#allocation61_spill] sm:$0xff]  ;;  %v7327_v54 = vld [vmem:[#allocation76_spill] sm:$0xff] }
 0x276   : > { %v3041_v21 = vpop.permute.xlu1 %3040  ;;  %v3009_v26 = vpop.permute.xlu0 %3008 }
 0x277   : > { %v3056_v18 = vsel %vm632_vm15, %v3055_v48, %v3041_v21  ;;  %v3048_v0 = vsel %vm630_vm14, %v3047_v30, %v3009_v26  ;;  %v7315_v30 = vld [vmem:[#allocation14_spill] sm:$0xff] }
 0x278   : > { %3955 = vmatprep.subr.mxu0 %v3056_v18 }
 0x27a   : > { %v6771_v17 = vpop.permute.xlu1 %1812  ;;  %v1781_v4 = vpop.permute.xlu0 %1780 }
 0x27b   : > { %v6777_v33 = vsel %vm620_vm9, %v7313_v62, %v1781_v4  ;;  %v1843_v4 = vsel %vm622_vm10, %v6757_v7, %v6771_v17  ;;  %v7318_v17 = vld [vmem:[#allocation13_spill] sm:$0xff] }
 0x27e   : > { %v2245_v32 = vpop.permute.xlu1 %2244  ;;  %v2213_v37 = vpop.permute.xlu0 %2212 }
 0x27f   : > { %v2269_v22 = vsel %vm626_vm12, %v2268_v63, %v2245_v32  ;;  %v2261_v14 = vsel %vm624_vm11, %v6761_v5, %v2213_v37 }
 0x282   : > { %v2677_v3 = vpop.permute.xlu1 %2676  ;;  %v2645_v19 = vpop.permute.xlu0 %2644 }
 0x283   : > { %v2695_v8 = vsel %vm630_vm14, %v2694_v28, %v2677_v3  ;;  %v2687_v35 = vsel %vm628_vm13, %v2686_v60, %v2645_v19  ;;  %v7324_v28 = vld [vmem:[#allocation62_spill] sm:$0xff] }
 0x286   : > { %v6784_v20 = vpop.permute.xlu1 %1448  ;;  %v3013_v24 = vpop.permute.xlu0 %3012 }
 0x287   : > { %v3049_v43 = vsel %vm632_vm15, %v3048_v0, %v3013_v24  ;;  %v7316_v0 = vld [vmem:[#allocation15_spill] sm:$0xff] }
 0x288   : > { %3956 = vmatpush1.msra.mxu0 %v3049_v43  ;;  %v7317_v24 = vcombine.low %v7315_v30, %v7316_v0  ;;  %v7319_v43 = vld [vmem:[#allocation55_spill] sm:$0xff] }
 0x289   : > { %v7343_v30 = vld [vmem:[#allocation79_spill] sm:$0xff] }
 0x28a   : > { %v1817_v9 = vpop.permute.xlu1 %1816  ;;  %v6788_v47 = vpop.permute.xlu0 %1784  ;;  %v621_v7 = vsel %vm620_vm9, %v7317_v24, %v7314_v57  ;;  %v7344_v24 = vld [vmem:[#allocation87_spill] sm:$0xff] }
 0x28b   : > { %v1844_v12 = vsel %vm624_vm11, %v1843_v4, %v1817_v9  ;;  %v7320_v9 = vld [vmem:[#allocation58_spill] sm:$0xff]  ;;  %v623_v60 = vsel %vm622_vm10, %v621_v7, %v7327_v54  ;;  %v7351_v54 = vld [vmem:[#allocation81_spill] sm:$0xff] }
 0x28c   : > { %v625_v0 = vsel %vm624_vm11, %v623_v60, %v7343_v30  ;;  %v7345_v7 = vld [vmem:[#allocation90_spill] sm:$0xff] }
 0x28e   : > { %v2249_v59 = vpop.permute.xlu1 %2248  ;;  %v2217_v61 = vpop.permute.xlu0 %2216 }
 0x28f   : > { %v2270_v27 = vsel %vm628_vm13, %v2269_v22, %v2249_v59  ;;  %v2262_v48 = vsel %vm626_vm12, %v2261_v14, %v2217_v61  ;;  %v7321_v59 = vcombine.low %v7319_v43, %v7320_v9  ;;  %v7322_v61 = vld [vmem:[#allocation45_spill] sm:$0xff]  ;;  %v7346_v43 = vld [vmem:[#allocation70_spill] sm:$0xff] }
 0x291   : > { %v1051_v1 = vsel %vm620_vm9, %v7321_v59, %v7318_v17 }
 0x292   : > { %v2681_v44 = vpop.permute.xlu1 %2680  ;;  %v2649_v56 = vpop.permute.xlu0 %2648 }
 0x293   : > { %v2696_v49 = vsel %vm632_vm15, %v2695_v8, %v2681_v44  ;;  %v2688_v52 = vsel %vm630_vm14, %v2687_v35, %v2649_v56  ;;  %v7325_v8 = vcombine.low %v7323_v53, %v7324_v28  ;;  %v7328_v35 = vld [vmem:[#allocation82_spill] sm:$0xff]  ;;  %v7348_v53 = vld [vmem:[#allocation47_spill] sm:$0xff] }
 0x294   : > { %3957 = vmatprep.subr.mxu0 %v2696_v49  ;;  %v7326_v49 = vld [vmem:[#allocation93_spill] sm:$0xff] }
 0x295   : > { %v1058_v44 = vsel %vm620_vm9, %v7325_v8, %v7322_v61 }
 0x296   : > { %v6797_v42 = vpop.permute.xlu1 %1452  ;;  %v1421_v2 = vpop.permute.xlu0 %1420 }
 0x29a   : > { %v1821_v15 = vpop.permute.xlu1 %1820  ;;  %v1789_v55 = vpop.permute.xlu0 %1788 }
 0x29b   : > { %v1845_v62 = vsel %vm626_vm12, %v1844_v12, %v1821_v15  ;;  %v1059_v15 = vsel %vm622_vm10, %v1058_v44, %v7326_v49  ;;  %v7349_v49 = vld [vmem:[#allocation78_spill] sm:$0xff] }
 0x29e   : > { %v2253_v36 = vpop.permute.xlu1 %2252  ;;  %v2221_v40 = vpop.permute.xlu0 %2220 }
 0x29f   : > { %v2271_v45 = vsel %vm630_vm14, %v2270_v27, %v2253_v36  ;;  %v2263_v23 = vsel %vm628_vm13, %v2262_v48, %v2221_v40  ;;  %v1836_v36 = vsel %vm622_vm10, %v6777_v33, %v6788_v47  ;;  %v7333_v27 = vld [vmem:[#allocation85_spill] sm:$0xff]  ;;  %v7335_v47 = vld [vmem:[#allocation24_spill] sm:$0xff] }
 0x2a0   : > { %v1837_v22 = vsel %vm624_vm11, %v1836_v36, %v1789_v55  ;;  %v7350_v36 = vld [vmem:[#allocation86_spill] sm:$0xff] }
 0x2a2   : > { %v1425_v16 = vpop.permute.xlu1 %1424  ;;  %v2653_v11 = vpop.permute.xlu0 %2652 }
 0x2a3   : > { %v2689_v41 = vsel %vm632_vm15, %v2688_v52, %v2653_v11  ;;  %v7329_v52 = vld [vmem:[#allocation16_spill] sm:$0xff]  ;;  %v7330_v11 = vld [vmem:[#allocation17_spill] sm:$0xff] }
 0x2a4   : > { %3958 = vmatpush1.msra.mxu0 %v2689_v41  ;;  %v7331_v41 = vcombine.low %v7329_v52, %v7330_v11 }
 0x2a6   : > { %v1793_v13 = vpop.permute.xlu1 %1792  ;;  %v1457_v29 = vpop.permute.xlu0 %1456 }
 0x2a7   : > { %v1838_v48 = vsel %vm626_vm12, %v1837_v22, %v1793_v13  ;;  %v7356_v22 = vld [vmem:[#allocation88_spill] sm:$0xff] }
 0x2aa   : > { %v2225_v6 = vpop.permute.xlu1 %2224  ;;  %v1825_v10 = vpop.permute.xlu0 %1824 }
 0x2ab   : > { %v2264_v25 = vsel %vm630_vm14, %v2263_v23, %v2225_v6  ;;  %v1846_v32 = vsel %vm628_vm13, %v1845_v62, %v1825_v10  ;;  %v634_v6 = vsel %vm620_vm9, %v7331_v41, %v7328_v35  ;;  %v7332_v10 = vld [vmem:[#allocation21_spill] sm:$0xff]  ;;  %v7337_v23 = vld [vmem:[#allocation52_spill] sm:$0xff] }
 0x2ac   : > { %v1052_v63 = vsel %vm622_vm10, %v1051_v1, %v7332_v10  ;;  %v7347_v1 = vld [vmem:[#allocation43_spill] sm:$0xff]  ;;  %v7352_v35 = vld [vmem:[#allocation89_spill] sm:$0xff]  ;;  %v7355_v10 = vld [vmem:[#allocation92_spill] sm:$0xff] }
 0x2ad   : > { %v7354_v41 = vld [vmem:[#allocation65_spill] sm:$0xff] }
 0x2ae   : > { %v1429_v31 = vpop.permute.xlu1 %1428  ;;  %v2257_v50 = vpop.permute.xlu0 %2256 }
 0x2af   : > { %v2272_v46 = vsel %vm632_vm15, %v2271_v45, %v2257_v50  ;;  %v635_v45 = vsel %vm622_vm10, %v634_v6, %v7333_v27  ;;  %v7334_v50 = vld [vmem:[#allocation91_spill] sm:$0xff] }
 0x2b0   : > { %3959 = vmatprep.subr.mxu0 %v2272_v46  ;;  %v1053_v33 = vsel %vm624_vm11, %v1052_v63, %v7334_v50  ;;  %v7336_v46 = vcombine.low %v6346_v34, %v7335_v47  ;;  %v7358_v47 = vld [vmem:[#allocation83_spill] sm:$0xff] }
 0x2b1   : > { %v1054_v17 = vsel %vm626_vm12, %v1053_v33, %v7345_v7  ;;  %v3913_v33 = vld [vmem:[#allocation7] sm:$0xff] }
 0x2b2   : > { %v1797_v38 = vpop.permute.xlu1 %1796  ;;  %v1475_v14 = vsel %vm620_vm9, %v7336_v46, %v1421_v2  ;;  %v1055_v61 = vsel %vm628_vm13, %v1054_v17, %v7347_v1 }
 0x2b3   : > { %v1461_v58 = vpop.permute.xlu0 %1460  ;;  %v1476_v4 = vsel %vm622_vm10, %v1475_v14, %v1425_v16  ;;  %v1839_v12 = vsel %vm628_vm13, %v1838_v48, %v1797_v38  ;;  %v1056_v6 = vsel %vm630_vm14, %v1055_v61, %v7354_v41 }
 0x2b4   : > { %v1477_v13 = vsel %vm624_vm11, %v1476_v4, %v1429_v31  ;;  %v1057_v63 = vsel %vm632_vm15, %v1056_v6, %v7355_v10 }
 0x2b6   : > { %v2229_v21 = vpop.permute.xlu1 %2228 }
 0x2b7   : > { %v1829_v26 = vpop.permute.xlu0 %1828  ;;  %v2265_v18 = vsel %vm632_vm15, %v2264_v25, %v2229_v21  ;;  %v1060_v25 = vsel %vm624_vm11, %v1059_v15, %v7337_v23  ;;  %v7338_v21 = vld [vmem:[#allocation59_spill] sm:$0xff]  ;;  %v627_v15 = vsel %vm626_vm12, %v625_v0, %v7349_v49 }
 0x2b8   : > { %3960 = vmatpush1.msra.mxu0 %v2265_v18  ;;  %v1847_v37 = vsel %vm630_vm14, %v1846_v32, %v1829_v26  ;;  %v7339_v26 = vld [vmem:[#allocation20_spill] sm:$0xff]  ;;  %v7341_v32 = vld [vmem:[#allocation49_spill] sm:$0xff]  ;;  %v629_v60 = vsel %vm628_vm13, %v627_v15, %v7351_v54 }
 0x2b9   : > { %v7340_v55 = vcombine.low %v7338_v21, %v7339_v26  ;;  %v1061_v34 = vsel %vm626_vm12, %v1060_v25, %v7341_v32 }
 0x2ba   : > { %v1465_v39 = vpop.permute.xlu1 %1464 }
 0x2bb   : > { %v1433_v5 = vpop.permute.xlu0 %1432  ;;  %v1482_v18 = vsel %vm620_vm9, %v7340_v55, %v6784_v20 }
 0x2bc   : > { %v1483_v2 = vsel %vm622_vm10, %v1482_v18, %v6797_v42  ;;  %v1478_v16 = vsel %vm626_vm12, %v1477_v13, %v1433_v5 }
 0x2bd   : > { %v1484_v20 = vsel %vm624_vm11, %v1483_v2, %v1457_v29  ;;  %v1062_v29 = vsel %vm628_vm13, %v1061_v34, %v7346_v43 }
 0x2be   : > { %v1833_v3 = vpop.permute.xlu1 %1832  ;;  %v1485_v31 = vsel %vm626_vm12, %v1484_v20, %v1461_v58  ;;  %v1063_v58 = vsel %vm630_vm14, %v1062_v29, %v7348_v53 }
 0x2bf   : > { %v1801_v19 = vpop.permute.xlu0 %1800  ;;  %v1848_v51 = vsel %vm632_vm15, %v1847_v37, %v1833_v3  ;;  %v1486_v5 = vsel %vm628_vm13, %v1485_v31, %v1465_v39 }
 0x2c0   : > { %3961 = vmatprep.subr.mxu0 %v1848_v51  ;;  %v1840_v37 = vsel %vm630_vm14, %v1839_v12, %v1801_v19  ;;  %v7342_v51 = vld [vmem:[#allocation84_spill] sm:$0xff] }
 0x2c1   : > { %v636_v57 = vsel %vm624_vm11, %v635_v45, %v7342_v51  ;;  %v7357_v45 = vld [vmem:[#allocation80_spill] sm:$0xff] }
 0x2c2   : > { %v1469_v56 = vpop.permute.xlu1 %1468  ;;  %v637_v42 = vsel %vm626_vm12, %v636_v57, %v7344_v24  ;;  %v631_v50 = vsel %vm630_vm14, %v629_v60, %v7357_v45 }
 0x2c3   : > { %v1437_v40 = vpop.permute.xlu0 %1436  ;;  %v1487_v28 = vsel %vm630_vm14, %v1486_v5, %v1469_v56  ;;  %v638_v39 = vsel %vm628_vm13, %v637_v42, %v7350_v36  ;;  %v7353_v56 = vld [vmem:[#allocation69_spill] sm:$0xff]  ;;  %v633_v46 = vsel %vm632_vm15, %v631_v50, %v7358_v47 }
 0x2c4   : > { %v1479_v19 = vsel %vm628_vm13, %v1478_v16, %v1437_v40  ;;  %v639_v52 = vsel %vm630_vm14, %v638_v39, %v7352_v35  ;;  %v1064_v11 = vsel %vm632_vm15, %v1063_v58, %v7353_v56 }
 0x2c5   : > { %v640_v27 = vsel %vm632_vm15, %v639_v52, %v7356_v22 }
 0x2c6   : > { %v1441_v62 = vpop.permute.xlu1 %1440 }
 0x2c7   : > { %v1805_v3 = vpop.permute.xlu0 %1804  ;;  %v1480_v9 = vsel %vm630_vm14, %v1479_v19, %v1441_v62 }
 0x2c8   : > { %v1841_v38 = vsel %vm632_vm15, %v1840_v37, %v1805_v3 }
 0x2c9   : > { %3962 = vmatpush1.msra.mxu0 %v1841_v38 }
 0x2ca   : > { %v1445_v59 = vpop.permute.xlu1 %1444 }
 0x2cb   : > { %v1473_v8 = vpop.permute.xlu0 %1472  ;;  %v1481_v44 = vsel %vm632_vm15, %v1480_v9, %v1445_v59 }
 0x2cc   : > { %v1488_v40 = vsel %vm632_vm15, %v1487_v28, %v1473_v8 }
 0x2cd   : > { %3963 = vmatprep.subr.mxu0 %v1488_v40 }
 0x2ce   : > { %3964 = vmatpush1.msra.mxu0 %v1481_v44 }
 0x2cf   : > { %3965 = vmatprep.subr.mxu0 %v1064_v11 }
 0x2d0   : > { %3966 = vmatpush1.msra.mxu0 %v1057_v63 }
 0x2d1   : > { %3967 = vmatprep.subr.mxu0 %v640_v27 }
 0x2d2   : > { %3968 = vmatpush1.msra.mxu0 %v633_v46 }
 0x2d3   : > { %4116 = vmatmul.mubr.msk.f32.vlgmr.msra.gmra.mxu0 %vm628_vm13, %v3913_v33 }
 0x393   : > { %v4003_v14 = vpop.f32.mrf.mxu0 }
 0x394   : > { %4008 = vst [vmem:[%s174_s4] sm:$0xff] %v4003_v14 }
 0x395   : > { %v4005_v48 = vpop.f32.mrf.mxu0 }
 0x396   : > { %4009 = vst [vmem:[%s174_s4 + $0x8] sm:$0xff] %v4005_v48 }
 0x397   : > { %4320 = shalt.err (!%p4317_p0)
}
 0x398   : > { %s4321_s7 = scalar_lea.hbm %s4023_s24, 256  ;;  %s4325_s17 = scalar_lea.hbm %s6968_s2, 512 }
 0x399   : > { %p4322_p4 = scmp.ne.s32.totalorder %s4023_s24, %s4321_s7  ;;  %p4326_p6 = scmp.lt.s32.totalorder %s4023_s24, %s6968_s2 }
 0x39a   : > { %p4327_p13 = scmp.lt.s32.totalorder %s4325_s17, %s4321_s7 }
 0x39b   : > { %p4323_p11 = pnand %p4322_p4, %p7359_p1 }
 0x39c   : > { %p4328_p3 = por %p4327_p13, %p4326_p6 }
 0x39d   : > { %p4324_p5 = pneg %p4323_p11 }
 0x39f   : > { %p4329_p12 = pnand %p4328_p3, %p4324_p5 }
 0x3a1   : > { %4332 = shalt.err (!%p4329_p12)
}
 0x3a2   : > { %4132 = dma.vmem_to_hbm [thread:$0]  (%p7359_p1), %s6926_s5, 256, %s4023_s24, %s4011_s25  }
 0x3a3 PF: > { %s4037_s30 = sand.u32 1, %s4363_s9   ;;  %p7360_p7 = scmp.ne.s32.totalorder %s7075_s22, 0 }
 0x3a4   : > { %p7361_p8 = scmp.ge.s32.totalorder %s4375_s12, 2  ;;  %s4038_s27 = scalar_lea.sflag [#allocation6], %s4037_s30 }
 0x3a6   : > { %p4143_p9 = pnand %p7361_p8, %p7360_p7 }
 0x3a8   : > { %p4144_p10 = pneg %p4143_p9 }
 0x3aa   : > { %4358 = dma.done.wait (%p4144_p10), %s4038_s27, 256  }
 0x3ab   : > { %4360 = vsyncadd (%p4144_p10), %s4038_s27, 4294967040  ;;  %p16_p2 = scmp.ge.s32.totalorder %s4436_s15, 4   ;;  %s7362_s9 = smov %s4367_s10 }
 0x3ac   : > { %s7363_s10 = smov %s4371_s11  ;;  %s7364_s11 = smov %s4448_s18 }
 0x3ad   : > { %s7365_s12 = smov %s4436_s15  ;;  %18 = sbr.rel (!%p16_p2) target bundleno = 6 (0x6), region = 78 }
 0x3b2   :  { %4043 = vsyncpa [#allocation5], 1 }
 0x3b3   :  { %4045 = vsyncpa [#allocation5 + $0x1], 1 }
 0x3b4   :  { %4046 = vsyncpa [#allocation8], 1 }
 0x3b5   :  { %4047 = vsyncpa [#allocation6], 1 }
 0x3b6   :  { %4049 = vsyncpa [#allocation6 + $0x1], 1 }

</bundles_post_ra>
